<compile_context>
chip_gen: v7x
topology: tpu7x:2x2x1
jax: 0.10.0
libtpu: 0.0.40
codegen_flags: <defaults>
</compile_context>

<pallas_src>
import math

import jax
import jax.numpy as jnp
from jax import lax
from jax.experimental import pallas as pl
from jax.experimental.pallas import tpu as pltpu

# ---------------- small synthetic BERT config ----------------
B, S, H = 2, 8, 64          # batch, seq_len, hidden
NH, HD = 4, 16              # heads, head_dim (NH * HD == H)
I = 128                     # intermediate (FFN) size
L = 2                       # number of encoder layers
V = 100                     # vocab size
MAXPOS = 32                 # max position embeddings
LN_EPS = 1e-12              # BERT LayerNorm eps
PW = 3 * H                  # lane width of the packed small-parameter tensor

# row indices inside the packed [L, 8, PW] small-parameter tensor
(ROW_BQKV, ROW_BO, ROW_LN1G, ROW_LN1B,
 ROW_B1, ROW_B2, ROW_LN2G, ROW_LN2B) = range(8)


# ---------------- in-kernel math helpers ----------------
def _gelu_tanh(x):
    # tanh-approximate GELU: ~3 VALU ops + one EUP tanh per element.
    c = math.sqrt(2.0 / math.pi)
    return 0.5 * x * (1.0 + jnp.tanh(c * (x + 0.044715 * x * x * x)))


def _layer_norm(x, gamma, beta):
    mu = jnp.mean(x, axis=-1, keepdims=True)
    xc = x - mu
    var = jnp.mean(xc * xc, axis=-1, keepdims=True)
    inv = lax.rsqrt(var + LN_EPS)
    return xc * inv * gamma + beta


# ---------------- fused encoder kernel ----------------
def _encoder_kernel(emb_ref, mask_ref, embln_ref,
                    wqkv_ref, wo_ref, w1_ref, w2_ref, pv_ref,
                    out_ref):
    embln = embln_ref[...]                                       # [2, H] f32
    x = _layer_norm(emb_ref[...], embln[0:1, :], embln[1:2, :])  # [B*S, H] f32
    scale = 1.0 / math.sqrt(HD)

    for l in range(L):                                           # static unroll, L small
        last = (l == L - 1)
        pv = pv_ref[l]                                           # [8, PW] f32 (small)

        # ---- fused QKV projection: one [B*S,H] x [H,3H] bf16 matmul ----
        qkv = jnp.dot(x.astype(jnp.bfloat16), wqkv_ref[l],
                      preferred_element_type=jnp.float32)
        qkv = qkv + pv[ROW_BQKV:ROW_BQKV + 1, :]                 # [B*S, 3H]

        # ---- attention: keys/values never mix batches ----
        ctx_rows = []
        for b in range(B):
            qkv_b = qkv[b * S:(b + 1) * S]                       # [S, 3H]
            amask = mask_ref[b:b + 1, :]                         # [1, S] additive mask
            q_rows = slice(0, 1) if last else slice(0, S)        # CLS-only in last layer
            head_ctx = []
            for h in range(NH):
                q_h = qkv_b[q_rows, h * HD:(h + 1) * HD]         # [Sq, HD]
                k_h = qkv_b[:, H + h * HD:H + (h + 1) * HD]      # [S,  HD]
                v_h = qkv_b[:, 2 * H + h * HD:2 * H + (h + 1) * HD]
                # contract over the last dim of both operands -> no k transpose
                scores = lax.dot_general(
                    q_h, k_h, (((1,), (1,)), ((), ())),
                    preferred_element_type=jnp.float32) * scale + amask   # [Sq, S]
                m = jnp.max(scores, axis=-1, keepdims=True)
                p = jnp.exp(scores - m)
                inv = pl.reciprocal(jnp.sum(p, axis=-1, keepdims=True), approx=True)
                head_ctx.append(jnp.dot(p * inv, v_h,
                                        preferred_element_type=jnp.float32))  # [Sq, HD]
            ctx_rows.append(jnp.concatenate(head_ctx, axis=-1))  # [Sq, H] (in vregs)
        ctx = jnp.concatenate(ctx_rows, axis=0)                  # [B*Sq, H]

        if last:
            # only the CLS rows of x are needed downstream
            x_res = jnp.concatenate([x[b * S:b * S + 1, :] for b in range(B)], axis=0)
        else:
            x_res = x

        # ---- single output projection over all heads + residual + LN ----
        attn = jnp.dot(ctx.astype(jnp.bfloat16), wo_ref[l],
                       preferred_element_type=jnp.float32) + pv[ROW_BO:ROW_BO + 1, 0:H]
        h1 = _layer_norm(x_res + attn,
                         pv[ROW_LN1G:ROW_LN1G + 1, 0:H],
                         pv[ROW_LN1B:ROW_LN1B + 1, 0:H])

        # ---- FFN ----
        ff = jnp.dot(h1.astype(jnp.bfloat16), w1_ref[l],
                     preferred_element_type=jnp.float32) + pv[ROW_B1:ROW_B1 + 1, 0:I]
        ff = _gelu_tanh(ff)
        ff = jnp.dot(ff.astype(jnp.bfloat16), w2_ref[l],
                     preferred_element_type=jnp.float32) + pv[ROW_B2:ROW_B2 + 1, 0:H]
        x = _layer_norm(h1 + ff,
                        pv[ROW_LN2G:ROW_LN2G + 1, 0:H],
                        pv[ROW_LN2B:ROW_LN2B + 1, 0:H])

    # TextEncoder returns the hidden state at target_token_idx = 0 (CLS)
    out_ref[...] = x                                             # [B, H]


# ---------------- pallas_call wrapper ----------------
def text_encoder_forward(params, input_ids, attention_mask):
    # embeddings: word + position + token_type  (plain-JAX gathers)
    # TODO(synk): token_type_ids assumed all-zero (as in the CLIP text tower).
    word = jnp.take(params["word_emb"], input_ids, axis=0)       # [B, S, H]
    pos = params["pos_emb"][:S][None, :, :]                      # [1, S, H]
    typ = params["type_emb"][0][None, None, :]                   # [1, 1, H]
    emb = (word + pos + typ).astype(jnp.float32).reshape(B * S, H)

    # additive attention mask [B, S]
    addmask = (1.0 - attention_mask.astype(jnp.float32)) * -1e9

    out = pl.pallas_call(
        _encoder_kernel,
        out_shape=jax.ShapeDtypeStruct((B, H), jnp.float32),
        grid=(1,),
        in_specs=[
            pl.BlockSpec((B * S, H), lambda i: (0, 0)),          # embeddings (batch folded)
            pl.BlockSpec((B, S), lambda i: (0, 0)),              # additive mask
            pl.BlockSpec((2, H), lambda i: (0, 0)),              # emb LN gamma/beta
            pl.BlockSpec((L, H, 3 * H), lambda i: (0, 0, 0)),    # wqkv (bf16)
            pl.BlockSpec((L, H, H), lambda i: (0, 0, 0)),        # wo   (bf16)
            pl.BlockSpec((L, H, I), lambda i: (0, 0, 0)),        # w1   (bf16)
            pl.BlockSpec((L, I, H), lambda i: (0, 0, 0)),        # w2   (bf16)
            pl.BlockSpec((L, 8, PW), lambda i: (0, 0, 0)),       # packed small vectors
        ],
        out_specs=pl.BlockSpec((B, H), lambda i: (0, 0)),
        compiler_params=pltpu.CompilerParams(
            dimension_semantics=("arbitrary",)),
    )(emb, addmask, params["emb_ln"], params["wqkv"], params["wo"],
      params["w1"], params["w2"], params["pvec"])

    return out                                                   # [B, H]


# ---------------- parameter init (deterministic, synthetic) ----------------
def init_params(key):
    def nrm(k, shape, dtype=jnp.float32):
        return (jax.random.normal(k, shape, jnp.float32) * 0.02).astype(dtype)

    keys = iter(jax.random.split(key, 8))

    def pad_row(v):  # [L, w] -> [L, PW] (zero-pad lanes)
        return jnp.pad(v, ((0, 0), (0, PW - v.shape[-1])))

    # packed small per-layer vectors: [L, 8, PW]
    bqkv = jnp.zeros((L, 3 * H), jnp.float32)
    bo = jnp.zeros((L, H), jnp.float32)
    ln1_g = jnp.ones((L, H), jnp.float32)
    ln1_b = jnp.zeros((L, H), jnp.float32)
    b1 = jnp.zeros((L, I), jnp.float32)
    b2 = jnp.zeros((L, H), jnp.float32)
    ln2_g = jnp.ones((L, H), jnp.float32)
    ln2_b = jnp.zeros((L, H), jnp.float32)
    pvec = jnp.stack([pad_row(r) for r in
                      (bqkv, bo, ln1_g, ln1_b, b1, b2, ln2_g, ln2_b)], axis=1)

    params = {
        "word_emb": nrm(next(keys), (V, H)),
        "pos_emb": nrm(next(keys), (MAXPOS, H)),
        "type_emb": nrm(next(keys), (2, H)),
        "emb_ln": jnp.stack([jnp.ones((H,), jnp.float32),
                             jnp.zeros((H,), jnp.float32)], axis=0),   # [2, H]
        # stacked per-layer weight matrices, bf16 (halves weight DMA bytes)
        "wqkv": nrm(next(keys), (L, H, 3 * H), jnp.bfloat16),
        "wo": nrm(next(keys), (L, H, H), jnp.bfloat16),
        "w1": nrm(next(keys), (L, H, I), jnp.bfloat16),
        "w2": nrm(next(keys), (L, I, H), jnp.bfloat16),
        "pvec": pvec,
    }
    return params


if __name__ == "__main__":
    key = jax.random.PRNGKey(0)
    pkey, ikey = jax.random.split(key)
    params = init_params(pkey)

    input_ids = jax.random.randint(ikey, (B, S), 0, V, dtype=jnp.int32)
    # batch 0 fully valid; batch 1 has the last two tokens padded out
    attention_mask = jnp.array(
        [[1, 1, 1, 1, 1, 1, 1, 1],
         [1, 1, 1, 1, 1, 1, 0, 0]], dtype=jnp.int32)

    out = text_encoder_forward(params, input_ids, attention_mask)
    out = jax.block_until_ready(out)
    assert out.shape == (B, H) and out.dtype == jnp.float32
    print("KERNEL_OK")
</pallas_src>

<mosaic_0001>
module attributes {stable_mosaic.version = 11 : i64} {
  func.func @_encoder_kernel(%arg0: i32, %arg1: memref<16x64xf32, #tpu.memory_space<vmem>>, %arg2: memref<2x8xf32, #tpu.memory_space<vmem>>, %arg3: memref<2x64xf32, #tpu.memory_space<vmem>>, %arg4: memref<2x64x192xbf16, #tpu.memory_space<vmem>>, %arg5: memref<2x64x64xbf16, #tpu.memory_space<vmem>>, %arg6: memref<2x64x128xbf16, #tpu.memory_space<vmem>>, %arg7: memref<2x128x64xbf16, #tpu.memory_space<vmem>>, %arg8: memref<2x8x192xf32, #tpu.memory_space<vmem>>, %arg9: memref<2x64xf32, #tpu.memory_space<vmem>>) attributes {dimension_semantics = [#tpu.dimension_semantics<arbitrary>], iteration_bounds = array<i64: 1>, scalar_prefetch = 0 : i64, scratch_operands = 0 : i64, tpu.core_type = #tpu.core_type<tc>, window_params = [{pipeline_mode = #tpu.pipeline_mode<synchronous>, transform_indices = @transform_0, window_bounds = array<i64: 16, 64>}, {pipeline_mode = #tpu.pipeline_mode<synchronous>, transform_indices = @transform_1, window_bounds = array<i64: 2, 8>}, {pipeline_mode = #tpu.pipeline_mode<synchronous>, transform_indices = @transform_2, window_bounds = array<i64: 2, 64>}, {pipeline_mode = #tpu.pipeline_mode<synchronous>, transform_indices = @transform_3, window_bounds = array<i64: 2, 64, 192>}, {pipeline_mode = #tpu.pipeline_mode<synchronous>, transform_indices = @transform_4, window_bounds = array<i64: 2, 64, 64>}, {pipeline_mode = #tpu.pipeline_mode<synchronous>, transform_indices = @transform_5, window_bounds = array<i64: 2, 64, 128>}, {pipeline_mode = #tpu.pipeline_mode<synchronous>, transform_indices = @transform_6, window_bounds = array<i64: 2, 128, 64>}, {pipeline_mode = #tpu.pipeline_mode<synchronous>, transform_indices = @transform_7, window_bounds = array<i64: 2, 8, 192>}, {pipeline_mode = #tpu.pipeline_mode<synchronous>, transform_indices = @transform_8, window_bounds = array<i64: 2, 64>}]} {
    %c0 = arith.constant 0 : index
    %c0_0 = arith.constant 0 : index
    %0 = vector.load %arg3[%c0, %c0_0] : memref<2x64xf32, #tpu.memory_space<vmem>>, vector<2x64xf32>
    %c0_1 = arith.constant 0 : index
    %c0_2 = arith.constant 0 : index
    %1 = vector.load %arg1[%c0_1, %c0_2] : memref<16x64xf32, #tpu.memory_space<vmem>>, vector<16x64xf32>
    %2 = vector.extract_strided_slice %0 {offsets = [0, 0], sizes = [1, 64], strides = [1, 1]} : vector<2x64xf32> to vector<1x64xf32>
    %3 = vector.extract_strided_slice %0 {offsets = [1, 0], sizes = [1, 64], strides = [1, 1]} : vector<2x64xf32> to vector<1x64xf32>
    %cst = arith.constant dense<0.000000e+00> : vector<16xf32>
    %4 = vector.multi_reduction <add>, %1, %cst [1] : vector<16x64xf32> to vector<16xf32>
    %5 = vector.shape_cast %4 : vector<16xf32> to vector<16x1xf32>
    %cst_3 = arith.constant 6.400000e+01 : f32
    %6 = vector.broadcast %cst_3 : f32 to vector<16x1xf32>
    %7 = arith.divf %5, %6 : vector<16x1xf32>
    %8 = vector.broadcast %7 : vector<16x1xf32> to vector<16x64xf32>
    %9 = arith.subf %1, %8 : vector<16x64xf32>
    %10 = arith.mulf %9, %9 : vector<16x64xf32>
    %cst_4 = arith.constant dense<0.000000e+00> : vector<16xf32>
    %11 = vector.multi_reduction <add>, %10, %cst_4 [1] : vector<16x64xf32> to vector<16xf32>
    %12 = vector.shape_cast %11 : vector<16xf32> to vector<16x1xf32>
    %cst_5 = arith.constant 6.400000e+01 : f32
    %13 = vector.broadcast %cst_5 : f32 to vector<16x1xf32>
    %14 = arith.divf %12, %13 : vector<16x1xf32>
    %cst_6 = arith.constant 9.99999996E-13 : f32
    %15 = vector.broadcast %cst_6 : f32 to vector<16x1xf32>
    %16 = arith.addf %14, %15 : vector<16x1xf32>
    %17 = math.rsqrt %16 : vector<16x1xf32>
    %18 = vector.broadcast %17 : vector<16x1xf32> to vector<16x64xf32>
    %19 = arith.mulf %9, %18 : vector<16x64xf32>
    %20 = vector.broadcast %2 : vector<1x64xf32> to vector<16x64xf32>
    %21 = arith.mulf %19, %20 : vector<16x64xf32>
    %22 = vector.broadcast %3 : vector<1x64xf32> to vector<16x64xf32>
    %23 = arith.addf %21, %22 : vector<16x64xf32>
    %c0_7 = arith.constant 0 : index
    %c0_8 = arith.constant 0 : index
    %c0_9 = arith.constant 0 : index
    %24 = vector.load %arg8[%c0_7, %c0_8, %c0_9] : memref<2x8x192xf32, #tpu.memory_space<vmem>>, vector<1x8x192xf32>
    %25 = vector.shape_cast %24 : vector<1x8x192xf32> to vector<8x192xf32>
    %26 = arith.truncf %23 : vector<16x64xf32> to vector<16x64xbf16>
    %c0_10 = arith.constant 0 : index
    %c0_11 = arith.constant 0 : index
    %c0_12 = arith.constant 0 : index
    %27 = vector.load %arg4[%c0_10, %c0_11, %c0_12] : memref<2x64x192xbf16, #tpu.memory_space<vmem>>, vector<1x64x192xbf16>
    %28 = vector.shape_cast %27 : vector<1x64x192xbf16> to vector<64x192xbf16>
    %cst_13 = arith.constant dense<0.000000e+00> : vector<16x192xf32>
    %29 = tpu.matmul %26, %28, %cst_13 {dimension_numbers = #tpu.dot_dimension_numbers<[1], [0], [0], [1], [0, 0, 1, 1], [], []>} : vector<16x64xbf16>, vector<64x192xbf16>, vector<16x192xf32> -> vector<16x192xf32>
    %30 = vector.extract_strided_slice %25 {offsets = [0, 0], sizes = [1, 192], strides = [1, 1]} : vector<8x192xf32> to vector<1x192xf32>
    %31 = vector.broadcast %30 : vector<1x192xf32> to vector<16x192xf32>
    %32 = arith.addf %29, %31 : vector<16x192xf32>
    %33 = vector.extract_strided_slice %32 {offsets = [0, 0], sizes = [8, 192], strides = [1, 1]} : vector<16x192xf32> to vector<8x192xf32>
    %c0_14 = arith.constant 0 : index
    %c0_15 = arith.constant 0 : index
    %34 = vector.load %arg2[%c0_14, %c0_15] : memref<2x8xf32, #tpu.memory_space<vmem>>, vector<1x8xf32>
    %35 = vector.extract_strided_slice %33 {offsets = [0, 0], sizes = [8, 16], strides = [1, 1]} : vector<8x192xf32> to vector<8x16xf32>
    %36 = vector.extract_strided_slice %33 {offsets = [0, 64], sizes = [8, 16], strides = [1, 1]} : vector<8x192xf32> to vector<8x16xf32>
    %37 = vector.extract_strided_slice %33 {offsets = [0, 128], sizes = [8, 16], strides = [1, 1]} : vector<8x192xf32> to vector<8x16xf32>
    %cst_16 = arith.constant dense<0.000000e+00> : vector<8x8xf32>
    %38 = tpu.matmul %35, %36, %cst_16 {dimension_numbers = #tpu.dot_dimension_numbers<[1], [1], [0], [0], [0, 0, 1, 0], [], []>} : vector<8x16xf32>, vector<8x16xf32>, vector<8x8xf32> -> vector<8x8xf32>
    %cst_17 = arith.constant 2.500000e-01 : f32
    %39 = vector.broadcast %cst_17 : f32 to vector<8x8xf32>
    %40 = arith.mulf %38, %39 : vector<8x8xf32>
    %41 = vector.broadcast %34 : vector<1x8xf32> to vector<8x8xf32>
    %42 = arith.addf %40, %41 : vector<8x8xf32>
    %cst_18 = arith.constant dense<0xFF800000> : vector<8xf32>
    %43 = vector.multi_reduction <maximumf>, %42, %cst_18 [1] : vector<8x8xf32> to vector<8xf32>
    %44 = vector.shape_cast %43 : vector<8xf32> to vector<8x1xf32>
    %45 = vector.broadcast %44 : vector<8x1xf32> to vector<8x8xf32>
    %46 = arith.subf %42, %45 : vector<8x8xf32>
    %47 = math.exp %46 : vector<8x8xf32>
    %cst_19 = arith.constant dense<0.000000e+00> : vector<8xf32>
    %48 = vector.multi_reduction <add>, %47, %cst_19 [1] : vector<8x8xf32> to vector<8xf32>
    %49 = vector.shape_cast %48 : vector<8xf32> to vector<8x1xf32>
    %50 = tpu.reciprocal %49 {approx = true} : vector<8x1xf32> -> vector<8x1xf32>
    %51 = vector.broadcast %50 : vector<8x1xf32> to vector<8x8xf32>
    %52 = arith.mulf %47, %51 : vector<8x8xf32>
    %cst_20 = arith.constant dense<0.000000e+00> : vector<8x16xf32>
    %53 = tpu.matmul %52, %37, %cst_20 {dimension_numbers = #tpu.dot_dimension_numbers<[1], [0], [0], [1], [0, 0, 1, 1], [], []>} : vector<8x8xf32>, vector<8x16xf32>, vector<8x16xf32> -> vector<8x16xf32>
    %54 = vector.extract_strided_slice %33 {offsets = [0, 16], sizes = [8, 16], strides = [1, 1]} : vector<8x192xf32> to vector<8x16xf32>
    %55 = vector.extract_strided_slice %33 {offsets = [0, 80], sizes = [8, 16], strides = [1, 1]} : vector<8x192xf32> to vector<8x16xf32>
    %56 = vector.extract_strided_slice %33 {offsets = [0, 144], sizes = [8, 16], strides = [1, 1]} : vector<8x192xf32> to vector<8x16xf32>
    %cst_21 = arith.constant dense<0.000000e+00> : vector<8x8xf32>
    %57 = tpu.matmul %54, %55, %cst_21 {dimension_numbers = #tpu.dot_dimension_numbers<[1], [1], [0], [0], [0, 0, 1, 0], [], []>} : vector<8x16xf32>, vector<8x16xf32>, vector<8x8xf32> -> vector<8x8xf32>
    %cst_22 = arith.constant 2.500000e-01 : f32
    %58 = vector.broadcast %cst_22 : f32 to vector<8x8xf32>
    %59 = arith.mulf %57, %58 : vector<8x8xf32>
    %60 = vector.broadcast %34 : vector<1x8xf32> to vector<8x8xf32>
    %61 = arith.addf %59, %60 : vector<8x8xf32>
    %cst_23 = arith.constant dense<0xFF800000> : vector<8xf32>
    %62 = vector.multi_reduction <maximumf>, %61, %cst_23 [1] : vector<8x8xf32> to vector<8xf32>
    %63 = vector.shape_cast %62 : vector<8xf32> to vector<8x1xf32>
    %64 = vector.broadcast %63 : vector<8x1xf32> to vector<8x8xf32>
    %65 = arith.subf %61, %64 : vector<8x8xf32>
    %66 = math.exp %65 : vector<8x8xf32>
    %cst_24 = arith.constant dense<0.000000e+00> : vector<8xf32>
    %67 = vector.multi_reduction <add>, %66, %cst_24 [1] : vector<8x8xf32> to vector<8xf32>
    %68 = vector.shape_cast %67 : vector<8xf32> to vector<8x1xf32>
    %69 = tpu.reciprocal %68 {approx = true} : vector<8x1xf32> -> vector<8x1xf32>
    %70 = vector.broadcast %69 : vector<8x1xf32> to vector<8x8xf32>
    %71 = arith.mulf %66, %70 : vector<8x8xf32>
    %cst_25 = arith.constant dense<0.000000e+00> : vector<8x16xf32>
    %72 = tpu.matmul %71, %56, %cst_25 {dimension_numbers = #tpu.dot_dimension_numbers<[1], [0], [0], [1], [0, 0, 1, 1], [], []>} : vector<8x8xf32>, vector<8x16xf32>, vector<8x16xf32> -> vector<8x16xf32>
    %73 = vector.extract_strided_slice %33 {offsets = [0, 32], sizes = [8, 16], strides = [1, 1]} : vector<8x192xf32> to vector<8x16xf32>
    %74 = vector.extract_strided_slice %33 {offsets = [0, 96], sizes = [8, 16], strides = [1, 1]} : vector<8x192xf32> to vector<8x16xf32>
    %75 = vector.extract_strided_slice %33 {offsets = [0, 160], sizes = [8, 16], strides = [1, 1]} : vector<8x192xf32> to vector<8x16xf32>
    %cst_26 = arith.constant dense<0.000000e+00> : vector<8x8xf32>
    %76 = tpu.matmul %73, %74, %cst_26 {dimension_numbers = #tpu.dot_dimension_numbers<[1], [1], [0], [0], [0, 0, 1, 0], [], []>} : vector<8x16xf32>, vector<8x16xf32>, vector<8x8xf32> -> vector<8x8xf32>
    %cst_27 = arith.constant 2.500000e-01 : f32
    %77 = vector.broadcast %cst_27 : f32 to vector<8x8xf32>
    %78 = arith.mulf %76, %77 : vector<8x8xf32>
    %79 = vector.broadcast %34 : vector<1x8xf32> to vector<8x8xf32>
    %80 = arith.addf %78, %79 : vector<8x8xf32>
    %cst_28 = arith.constant dense<0xFF800000> : vector<8xf32>
    %81 = vector.multi_reduction <maximumf>, %80, %cst_28 [1] : vector<8x8xf32> to vector<8xf32>
    %82 = vector.shape_cast %81 : vector<8xf32> to vector<8x1xf32>
    %83 = vector.broadcast %82 : vector<8x1xf32> to vector<8x8xf32>
    %84 = arith.subf %80, %83 : vector<8x8xf32>
    %85 = math.exp %84 : vector<8x8xf32>
    %cst_29 = arith.constant dense<0.000000e+00> : vector<8xf32>
    %86 = vector.multi_reduction <add>, %85, %cst_29 [1] : vector<8x8xf32> to vector<8xf32>
    %87 = vector.shape_cast %86 : vector<8xf32> to vector<8x1xf32>
    %88 = tpu.reciprocal %87 {approx = true} : vector<8x1xf32> -> vector<8x1xf32>
    %89 = vector.broadcast %88 : vector<8x1xf32> to vector<8x8xf32>
    %90 = arith.mulf %85, %89 : vector<8x8xf32>
    %cst_30 = arith.constant dense<0.000000e+00> : vector<8x16xf32>
    %91 = tpu.matmul %90, %75, %cst_30 {dimension_numbers = #tpu.dot_dimension_numbers<[1], [0], [0], [1], [0, 0, 1, 1], [], []>} : vector<8x8xf32>, vector<8x16xf32>, vector<8x16xf32> -> vector<8x16xf32>
    %92 = vector.extract_strided_slice %33 {offsets = [0, 48], sizes = [8, 16], strides = [1, 1]} : vector<8x192xf32> to vector<8x16xf32>
    %93 = vector.extract_strided_slice %33 {offsets = [0, 112], sizes = [8, 16], strides = [1, 1]} : vector<8x192xf32> to vector<8x16xf32>
    %94 = vector.extract_strided_slice %33 {offsets = [0, 176], sizes = [8, 16], strides = [1, 1]} : vector<8x192xf32> to vector<8x16xf32>
    %cst_31 = arith.constant dense<0.000000e+00> : vector<8x8xf32>
    %95 = tpu.matmul %92, %93, %cst_31 {dimension_numbers = #tpu.dot_dimension_numbers<[1], [1], [0], [0], [0, 0, 1, 0], [], []>} : vector<8x16xf32>, vector<8x16xf32>, vector<8x8xf32> -> vector<8x8xf32>
    %cst_32 = arith.constant 2.500000e-01 : f32
    %96 = vector.broadcast %cst_32 : f32 to vector<8x8xf32>
    %97 = arith.mulf %95, %96 : vector<8x8xf32>
    %98 = vector.broadcast %34 : vector<1x8xf32> to vector<8x8xf32>
    %99 = arith.addf %97, %98 : vector<8x8xf32>
    %cst_33 = arith.constant dense<0xFF800000> : vector<8xf32>
    %100 = vector.multi_reduction <maximumf>, %99, %cst_33 [1] : vector<8x8xf32> to vector<8xf32>
    %101 = vector.shape_cast %100 : vector<8xf32> to vector<8x1xf32>
    %102 = vector.broadcast %101 : vector<8x1xf32> to vector<8x8xf32>
    %103 = arith.subf %99, %102 : vector<8x8xf32>
    %104 = math.exp %103 : vector<8x8xf32>
    %cst_34 = arith.constant dense<0.000000e+00> : vector<8xf32>
    %105 = vector.multi_reduction <add>, %104, %cst_34 [1] : vector<8x8xf32> to vector<8xf32>
    %106 = vector.shape_cast %105 : vector<8xf32> to vector<8x1xf32>
    %107 = tpu.reciprocal %106 {approx = true} : vector<8x1xf32> -> vector<8x1xf32>
    %108 = vector.broadcast %107 : vector<8x1xf32> to vector<8x8xf32>
    %109 = arith.mulf %104, %108 : vector<8x8xf32>
    %cst_35 = arith.constant dense<0.000000e+00> : vector<8x16xf32>
    %110 = tpu.matmul %109, %94, %cst_35 {dimension_numbers = #tpu.dot_dimension_numbers<[1], [0], [0], [1], [0, 0, 1, 1], [], []>} : vector<8x8xf32>, vector<8x16xf32>, vector<8x16xf32> -> vector<8x16xf32>
    %111 = tpu.concatenate %53, %72, %91, %110 in 1 : vector<8x16xf32>, vector<8x16xf32>, vector<8x16xf32>, vector<8x16xf32> -> vector<8x64xf32>
    %112 = vector.extract_strided_slice %32 {offsets = [8, 0], sizes = [8, 192], strides = [1, 1]} : vector<16x192xf32> to vector<8x192xf32>
    %c1 = arith.constant 1 : index
    %c0_36 = arith.constant 0 : index
    %113 = vector.load %arg2[%c1, %c0_36] : memref<2x8xf32, #tpu.memory_space<vmem>>, vector<1x8xf32>
    %114 = vector.extract_strided_slice %112 {offsets = [0, 0], sizes = [8, 16], strides = [1, 1]} : vector<8x192xf32> to vector<8x16xf32>
    %115 = vector.extract_strided_slice %112 {offsets = [0, 64], sizes = [8, 16], strides = [1, 1]} : vector<8x192xf32> to vector<8x16xf32>
    %116 = vector.extract_strided_slice %112 {offsets = [0, 128], sizes = [8, 16], strides = [1, 1]} : vector<8x192xf32> to vector<8x16xf32>
    %cst_37 = arith.constant dense<0.000000e+00> : vector<8x8xf32>
    %117 = tpu.matmul %114, %115, %cst_37 {dimension_numbers = #tpu.dot_dimension_numbers<[1], [1], [0], [0], [0, 0, 1, 0], [], []>} : vector<8x16xf32>, vector<8x16xf32>, vector<8x8xf32> -> vector<8x8xf32>
    %cst_38 = arith.constant 2.500000e-01 : f32
    %118 = vector.broadcast %cst_38 : f32 to vector<8x8xf32>
    %119 = arith.mulf %117, %118 : vector<8x8xf32>
    %120 = vector.broadcast %113 : vector<1x8xf32> to vector<8x8xf32>
    %121 = arith.addf %119, %120 : vector<8x8xf32>
    %cst_39 = arith.constant dense<0xFF800000> : vector<8xf32>
    %122 = vector.multi_reduction <maximumf>, %121, %cst_39 [1] : vector<8x8xf32> to vector<8xf32>
    %123 = vector.shape_cast %122 : vector<8xf32> to vector<8x1xf32>
    %124 = vector.broadcast %123 : vector<8x1xf32> to vector<8x8xf32>
    %125 = arith.subf %121, %124 : vector<8x8xf32>
    %126 = math.exp %125 : vector<8x8xf32>
    %cst_40 = arith.constant dense<0.000000e+00> : vector<8xf32>
    %127 = vector.multi_reduction <add>, %126, %cst_40 [1] : vector<8x8xf32> to vector<8xf32>
    %128 = vector.shape_cast %127 : vector<8xf32> to vector<8x1xf32>
    %129 = tpu.reciprocal %128 {approx = true} : vector<8x1xf32> -> vector<8x1xf32>
    %130 = vector.broadcast %129 : vector<8x1xf32> to vector<8x8xf32>
    %131 = arith.mulf %126, %130 : vector<8x8xf32>
    %cst_41 = arith.constant dense<0.000000e+00> : vector<8x16xf32>
    %132 = tpu.matmul %131, %116, %cst_41 {dimension_numbers = #tpu.dot_dimension_numbers<[1], [0], [0], [1], [0, 0, 1, 1], [], []>} : vector<8x8xf32>, vector<8x16xf32>, vector<8x16xf32> -> vector<8x16xf32>
    %133 = vector.extract_strided_slice %112 {offsets = [0, 16], sizes = [8, 16], strides = [1, 1]} : vector<8x192xf32> to vector<8x16xf32>
    %134 = vector.extract_strided_slice %112 {offsets = [0, 80], sizes = [8, 16], strides = [1, 1]} : vector<8x192xf32> to vector<8x16xf32>
    %135 = vector.extract_strided_slice %112 {offsets = [0, 144], sizes = [8, 16], strides = [1, 1]} : vector<8x192xf32> to vector<8x16xf32>
    %cst_42 = arith.constant dense<0.000000e+00> : vector<8x8xf32>
    %136 = tpu.matmul %133, %134, %cst_42 {dimension_numbers = #tpu.dot_dimension_numbers<[1], [1], [0], [0], [0, 0, 1, 0], [], []>} : vector<8x16xf32>, vector<8x16xf32>, vector<8x8xf32> -> vector<8x8xf32>
    %cst_43 = arith.constant 2.500000e-01 : f32
    %137 = vector.broadcast %cst_43 : f32 to vector<8x8xf32>
    %138 = arith.mulf %136, %137 : vector<8x8xf32>
    %139 = vector.broadcast %113 : vector<1x8xf32> to vector<8x8xf32>
    %140 = arith.addf %138, %139 : vector<8x8xf32>
    %cst_44 = arith.constant dense<0xFF800000> : vector<8xf32>
    %141 = vector.multi_reduction <maximumf>, %140, %cst_44 [1] : vector<8x8xf32> to vector<8xf32>
    %142 = vector.shape_cast %141 : vector<8xf32> to vector<8x1xf32>
    %143 = vector.broadcast %142 : vector<8x1xf32> to vector<8x8xf32>
    %144 = arith.subf %140, %143 : vector<8x8xf32>
    %145 = math.exp %144 : vector<8x8xf32>
    %cst_45 = arith.constant dense<0.000000e+00> : vector<8xf32>
    %146 = vector.multi_reduction <add>, %145, %cst_45 [1] : vector<8x8xf32> to vector<8xf32>
    %147 = vector.shape_cast %146 : vector<8xf32> to vector<8x1xf32>
    %148 = tpu.reciprocal %147 {approx = true} : vector<8x1xf32> -> vector<8x1xf32>
    %149 = vector.broadcast %148 : vector<8x1xf32> to vector<8x8xf32>
    %150 = arith.mulf %145, %149 : vector<8x8xf32>
    %cst_46 = arith.constant dense<0.000000e+00> : vector<8x16xf32>
    %151 = tpu.matmul %150, %135, %cst_46 {dimension_numbers = #tpu.dot_dimension_numbers<[1], [0], [0], [1], [0, 0, 1, 1], [], []>} : vector<8x8xf32>, vector<8x16xf32>, vector<8x16xf32> -> vector<8x16xf32>
    %152 = vector.extract_strided_slice %112 {offsets = [0, 32], sizes = [8, 16], strides = [1, 1]} : vector<8x192xf32> to vector<8x16xf32>
    %153 = vector.extract_strided_slice %112 {offsets = [0, 96], sizes = [8, 16], strides = [1, 1]} : vector<8x192xf32> to vector<8x16xf32>
    %154 = vector.extract_strided_slice %112 {offsets = [0, 160], sizes = [8, 16], strides = [1, 1]} : vector<8x192xf32> to vector<8x16xf32>
    %cst_47 = arith.constant dense<0.000000e+00> : vector<8x8xf32>
    %155 = tpu.matmul %152, %153, %cst_47 {dimension_numbers = #tpu.dot_dimension_numbers<[1], [1], [0], [0], [0, 0, 1, 0], [], []>} : vector<8x16xf32>, vector<8x16xf32>, vector<8x8xf32> -> vector<8x8xf32>
    %cst_48 = arith.constant 2.500000e-01 : f32
    %156 = vector.broadcast %cst_48 : f32 to vector<8x8xf32>
    %157 = arith.mulf %155, %156 : vector<8x8xf32>
    %158 = vector.broadcast %113 : vector<1x8xf32> to vector<8x8xf32>
    %159 = arith.addf %157, %158 : vector<8x8xf32>
    %cst_49 = arith.constant dense<0xFF800000> : vector<8xf32>
    %160 = vector.multi_reduction <maximumf>, %159, %cst_49 [1] : vector<8x8xf32> to vector<8xf32>
    %161 = vector.shape_cast %160 : vector<8xf32> to vector<8x1xf32>
    %162 = vector.broadcast %161 : vector<8x1xf32> to vector<8x8xf32>
    %163 = arith.subf %159, %162 : vector<8x8xf32>
    %164 = math.exp %163 : vector<8x8xf32>
    %cst_50 = arith.constant dense<0.000000e+00> : vector<8xf32>
    %165 = vector.multi_reduction <add>, %164, %cst_50 [1] : vector<8x8xf32> to vector<8xf32>
    %166 = vector.shape_cast %165 : vector<8xf32> to vector<8x1xf32>
    %167 = tpu.reciprocal %166 {approx = true} : vector<8x1xf32> -> vector<8x1xf32>
    %168 = vector.broadcast %167 : vector<8x1xf32> to vector<8x8xf32>
    %169 = arith.mulf %164, %168 : vector<8x8xf32>
    %cst_51 = arith.constant dense<0.000000e+00> : vector<8x16xf32>
    %170 = tpu.matmul %169, %154, %cst_51 {dimension_numbers = #tpu.dot_dimension_numbers<[1], [0], [0], [1], [0, 0, 1, 1], [], []>} : vector<8x8xf32>, vector<8x16xf32>, vector<8x16xf32> -> vector<8x16xf32>
    %171 = vector.extract_strided_slice %112 {offsets = [0, 48], sizes = [8, 16], strides = [1, 1]} : vector<8x192xf32> to vector<8x16xf32>
    %172 = vector.extract_strided_slice %112 {offsets = [0, 112], sizes = [8, 16], strides = [1, 1]} : vector<8x192xf32> to vector<8x16xf32>
    %173 = vector.extract_strided_slice %112 {offsets = [0, 176], sizes = [8, 16], strides = [1, 1]} : vector<8x192xf32> to vector<8x16xf32>
    %cst_52 = arith.constant dense<0.000000e+00> : vector<8x8xf32>
    %174 = tpu.matmul %171, %172, %cst_52 {dimension_numbers = #tpu.dot_dimension_numbers<[1], [1], [0], [0], [0, 0, 1, 0], [], []>} : vector<8x16xf32>, vector<8x16xf32>, vector<8x8xf32> -> vector<8x8xf32>
    %cst_53 = arith.constant 2.500000e-01 : f32
    %175 = vector.broadcast %cst_53 : f32 to vector<8x8xf32>
    %176 = arith.mulf %174, %175 : vector<8x8xf32>
    %177 = vector.broadcast %113 : vector<1x8xf32> to vector<8x8xf32>
    %178 = arith.addf %176, %177 : vector<8x8xf32>
    %cst_54 = arith.constant dense<0xFF800000> : vector<8xf32>
    %179 = vector.multi_reduction <maximumf>, %178, %cst_54 [1] : vector<8x8xf32> to vector<8xf32>
    %180 = vector.shape_cast %179 : vector<8xf32> to vector<8x1xf32>
    %181 = vector.broadcast %180 : vector<8x1xf32> to vector<8x8xf32>
    %182 = arith.subf %178, %181 : vector<8x8xf32>
    %183 = math.exp %182 : vector<8x8xf32>
    %cst_55 = arith.constant dense<0.000000e+00> : vector<8xf32>
    %184 = vector.multi_reduction <add>, %183, %cst_55 [1] : vector<8x8xf32> to vector<8xf32>
    %185 = vector.shape_cast %184 : vector<8xf32> to vector<8x1xf32>
    %186 = tpu.reciprocal %185 {approx = true} : vector<8x1xf32> -> vector<8x1xf32>
    %187 = vector.broadcast %186 : vector<8x1xf32> to vector<8x8xf32>
    %188 = arith.mulf %183, %187 : vector<8x8xf32>
    %cst_56 = arith.constant dense<0.000000e+00> : vector<8x16xf32>
    %189 = tpu.matmul %188, %173, %cst_56 {dimension_numbers = #tpu.dot_dimension_numbers<[1], [0], [0], [1], [0, 0, 1, 1], [], []>} : vector<8x8xf32>, vector<8x16xf32>, vector<8x16xf32> -> vector<8x16xf32>
    %190 = tpu.concatenate %132, %151, %170, %189 in 1 : vector<8x16xf32>, vector<8x16xf32>, vector<8x16xf32>, vector<8x16xf32> -> vector<8x64xf32>
    %191 = tpu.concatenate %111, %190 in 0 : vector<8x64xf32>, vector<8x64xf32> -> vector<16x64xf32>
    %192 = arith.truncf %191 : vector<16x64xf32> to vector<16x64xbf16>
    %c0_57 = arith.constant 0 : index
    %c0_58 = arith.constant 0 : index
    %c0_59 = arith.constant 0 : index
    %193 = vector.load %arg5[%c0_57, %c0_58, %c0_59] : memref<2x64x64xbf16, #tpu.memory_space<vmem>>, vector<1x64x64xbf16>
    %194 = vector.shape_cast %193 : vector<1x64x64xbf16> to vector<64x64xbf16>
    %cst_60 = arith.constant dense<0.000000e+00> : vector<16x64xf32>
    %195 = tpu.matmul %192, %194, %cst_60 {dimension_numbers = #tpu.dot_dimension_numbers<[1], [0], [0], [1], [0, 0, 1, 1], [], []>} : vector<16x64xbf16>, vector<64x64xbf16>, vector<16x64xf32> -> vector<16x64xf32>
    %196 = vector.extract_strided_slice %25 {offsets = [1, 0], sizes = [1, 64], strides = [1, 1]} : vector<8x192xf32> to vector<1x64xf32>
    %197 = vector.broadcast %196 : vector<1x64xf32> to vector<16x64xf32>
    %198 = arith.addf %195, %197 : vector<16x64xf32>
    %199 = arith.addf %23, %198 : vector<16x64xf32>
    %200 = vector.extract_strided_slice %25 {offsets = [2, 0], sizes = [1, 64], strides = [1, 1]} : vector<8x192xf32> to vector<1x64xf32>
    %201 = vector.extract_strided_slice %25 {offsets = [3, 0], sizes = [1, 64], strides = [1, 1]} : vector<8x192xf32> to vector<1x64xf32>
    %cst_61 = arith.constant dense<0.000000e+00> : vector<16xf32>
    %202 = vector.multi_reduction <add>, %199, %cst_61 [1] : vector<16x64xf32> to vector<16xf32>
    %203 = vector.shape_cast %202 : vector<16xf32> to vector<16x1xf32>
    %cst_62 = arith.constant 6.400000e+01 : f32
    %204 = vector.broadcast %cst_62 : f32 to vector<16x1xf32>
    %205 = arith.divf %203, %204 : vector<16x1xf32>
    %206 = vector.broadcast %205 : vector<16x1xf32> to vector<16x64xf32>
    %207 = arith.subf %199, %206 : vector<16x64xf32>
    %208 = arith.mulf %207, %207 : vector<16x64xf32>
    %cst_63 = arith.constant dense<0.000000e+00> : vector<16xf32>
    %209 = vector.multi_reduction <add>, %208, %cst_63 [1] : vector<16x64xf32> to vector<16xf32>
    %210 = vector.shape_cast %209 : vector<16xf32> to vector<16x1xf32>
    %cst_64 = arith.constant 6.400000e+01 : f32
    %211 = vector.broadcast %cst_64 : f32 to vector<16x1xf32>
    %212 = arith.divf %210, %211 : vector<16x1xf32>
    %cst_65 = arith.constant 9.99999996E-13 : f32
    %213 = vector.broadcast %cst_65 : f32 to vector<16x1xf32>
    %214 = arith.addf %212, %213 : vector<16x1xf32>
    %215 = math.rsqrt %214 : vector<16x1xf32>
    %216 = vector.broadcast %215 : vector<16x1xf32> to vector<16x64xf32>
    %217 = arith.mulf %207, %216 : vector<16x64xf32>
    %218 = vector.broadcast %200 : vector<1x64xf32> to vector<16x64xf32>
    %219 = arith.mulf %217, %218 : vector<16x64xf32>
    %220 = vector.broadcast %201 : vector<1x64xf32> to vector<16x64xf32>
    %221 = arith.addf %219, %220 : vector<16x64xf32>
    %222 = arith.truncf %221 : vector<16x64xf32> to vector<16x64xbf16>
    %c0_66 = arith.constant 0 : index
    %c0_67 = arith.constant 0 : index
    %c0_68 = arith.constant 0 : index
    %223 = vector.load %arg6[%c0_66, %c0_67, %c0_68] : memref<2x64x128xbf16, #tpu.memory_space<vmem>>, vector<1x64x128xbf16>
    %224 = vector.shape_cast %223 : vector<1x64x128xbf16> to vector<64x128xbf16>
    %cst_69 = arith.constant dense<0.000000e+00> : vector<16x128xf32>
    %225 = tpu.matmul %222, %224, %cst_69 {dimension_numbers = #tpu.dot_dimension_numbers<[1], [0], [0], [1], [0, 0, 1, 1], [], []>} : vector<16x64xbf16>, vector<64x128xbf16>, vector<16x128xf32> -> vector<16x128xf32>
    %226 = vector.extract_strided_slice %25 {offsets = [4, 0], sizes = [1, 128], strides = [1, 1]} : vector<8x192xf32> to vector<1x128xf32>
    %227 = vector.broadcast %226 : vector<1x128xf32> to vector<16x128xf32>
    %228 = arith.addf %225, %227 : vector<16x128xf32>
    %cst_70 = arith.constant 5.000000e-01 : f32
    %229 = vector.broadcast %cst_70 : f32 to vector<16x128xf32>
    %230 = arith.mulf %229, %228 : vector<16x128xf32>
    %cst_71 = arith.constant 4.471500e-02 : f32
    %231 = vector.broadcast %cst_71 : f32 to vector<16x128xf32>
    %232 = arith.mulf %231, %228 : vector<16x128xf32>
    %233 = arith.mulf %232, %228 : vector<16x128xf32>
    %234 = arith.mulf %233, %228 : vector<16x128xf32>
    %235 = arith.addf %228, %234 : vector<16x128xf32>
    %cst_72 = arith.constant 0.797884583 : f32
    %236 = vector.broadcast %cst_72 : f32 to vector<16x128xf32>
    %237 = arith.mulf %236, %235 : vector<16x128xf32>
    %238 = math.tanh %237 : vector<16x128xf32>
    %cst_73 = arith.constant 1.000000e+00 : f32
    %239 = vector.broadcast %cst_73 : f32 to vector<16x128xf32>
    %240 = arith.addf %239, %238 : vector<16x128xf32>
    %241 = arith.mulf %230, %240 : vector<16x128xf32>
    %242 = arith.truncf %241 : vector<16x128xf32> to vector<16x128xbf16>
    %c0_74 = arith.constant 0 : index
    %c0_75 = arith.constant 0 : index
    %c0_76 = arith.constant 0 : index
    %243 = vector.load %arg7[%c0_74, %c0_75, %c0_76] : memref<2x128x64xbf16, #tpu.memory_space<vmem>>, vector<1x128x64xbf16>
    %244 = vector.shape_cast %243 : vector<1x128x64xbf16> to vector<128x64xbf16>
    %cst_77 = arith.constant dense<0.000000e+00> : vector<16x64xf32>
    %245 = tpu.matmul %242, %244, %cst_77 {dimension_numbers = #tpu.dot_dimension_numbers<[1], [0], [0], [1], [0, 0, 1, 1], [], []>} : vector<16x128xbf16>, vector<128x64xbf16>, vector<16x64xf32> -> vector<16x64xf32>
    %246 = vector.extract_strided_slice %25 {offsets = [5, 0], sizes = [1, 64], strides = [1, 1]} : vector<8x192xf32> to vector<1x64xf32>
    %247 = vector.broadcast %246 : vector<1x64xf32> to vector<16x64xf32>
    %248 = arith.addf %245, %247 : vector<16x64xf32>
    %249 = arith.addf %221, %248 : vector<16x64xf32>
    %250 = vector.extract_strided_slice %25 {offsets = [6, 0], sizes = [1, 64], strides = [1, 1]} : vector<8x192xf32> to vector<1x64xf32>
    %251 = vector.extract_strided_slice %25 {offsets = [7, 0], sizes = [1, 64], strides = [1, 1]} : vector<8x192xf32> to vector<1x64xf32>
    %cst_78 = arith.constant dense<0.000000e+00> : vector<16xf32>
    %252 = vector.multi_reduction <add>, %249, %cst_78 [1] : vector<16x64xf32> to vector<16xf32>
    %253 = vector.shape_cast %252 : vector<16xf32> to vector<16x1xf32>
    %cst_79 = arith.constant 6.400000e+01 : f32
    %254 = vector.broadcast %cst_79 : f32 to vector<16x1xf32>
    %255 = arith.divf %253, %254 : vector<16x1xf32>
    %256 = vector.broadcast %255 : vector<16x1xf32> to vector<16x64xf32>
    %257 = arith.subf %249, %256 : vector<16x64xf32>
    %258 = arith.mulf %257, %257 : vector<16x64xf32>
    %cst_80 = arith.constant dense<0.000000e+00> : vector<16xf32>
    %259 = vector.multi_reduction <add>, %258, %cst_80 [1] : vector<16x64xf32> to vector<16xf32>
    %260 = vector.shape_cast %259 : vector<16xf32> to vector<16x1xf32>
    %cst_81 = arith.constant 6.400000e+01 : f32
    %261 = vector.broadcast %cst_81 : f32 to vector<16x1xf32>
    %262 = arith.divf %260, %261 : vector<16x1xf32>
    %cst_82 = arith.constant 9.99999996E-13 : f32
    %263 = vector.broadcast %cst_82 : f32 to vector<16x1xf32>
    %264 = arith.addf %262, %263 : vector<16x1xf32>
    %265 = math.rsqrt %264 : vector<16x1xf32>
    %266 = vector.broadcast %265 : vector<16x1xf32> to vector<16x64xf32>
    %267 = arith.mulf %257, %266 : vector<16x64xf32>
    %268 = vector.broadcast %250 : vector<1x64xf32> to vector<16x64xf32>
    %269 = arith.mulf %267, %268 : vector<16x64xf32>
    %270 = vector.broadcast %251 : vector<1x64xf32> to vector<16x64xf32>
    %271 = arith.addf %269, %270 : vector<16x64xf32>
    %c1_83 = arith.constant 1 : index
    %c0_84 = arith.constant 0 : index
    %c0_85 = arith.constant 0 : index
    %272 = vector.load %arg8[%c1_83, %c0_84, %c0_85] : memref<2x8x192xf32, #tpu.memory_space<vmem>>, vector<1x8x192xf32>
    %273 = vector.shape_cast %272 : vector<1x8x192xf32> to vector<8x192xf32>
    %274 = arith.truncf %271 : vector<16x64xf32> to vector<16x64xbf16>
    %c1_86 = arith.constant 1 : index
    %c0_87 = arith.constant 0 : index
    %c0_88 = arith.constant 0 : index
    %275 = vector.load %arg4[%c1_86, %c0_87, %c0_88] : memref<2x64x192xbf16, #tpu.memory_space<vmem>>, vector<1x64x192xbf16>
    %276 = vector.shape_cast %275 : vector<1x64x192xbf16> to vector<64x192xbf16>
    %cst_89 = arith.constant dense<0.000000e+00> : vector<16x192xf32>
    %277 = tpu.matmul %274, %276, %cst_89 {dimension_numbers = #tpu.dot_dimension_numbers<[1], [0], [0], [1], [0, 0, 1, 1], [], []>} : vector<16x64xbf16>, vector<64x192xbf16>, vector<16x192xf32> -> vector<16x192xf32>
    %278 = vector.extract_strided_slice %273 {offsets = [0, 0], sizes = [1, 192], strides = [1, 1]} : vector<8x192xf32> to vector<1x192xf32>
    %279 = vector.broadcast %278 : vector<1x192xf32> to vector<16x192xf32>
    %280 = arith.addf %277, %279 : vector<16x192xf32>
    %281 = vector.extract_strided_slice %280 {offsets = [0, 0], sizes = [8, 192], strides = [1, 1]} : vector<16x192xf32> to vector<8x192xf32>
    %c0_90 = arith.constant 0 : index
    %c0_91 = arith.constant 0 : index
    %282 = vector.load %arg2[%c0_90, %c0_91] : memref<2x8xf32, #tpu.memory_space<vmem>>, vector<1x8xf32>
    %283 = vector.extract_strided_slice %281 {offsets = [0, 0], sizes = [1, 16], strides = [1, 1]} : vector<8x192xf32> to vector<1x16xf32>
    %284 = vector.extract_strided_slice %281 {offsets = [0, 64], sizes = [8, 16], strides = [1, 1]} : vector<8x192xf32> to vector<8x16xf32>
    %285 = vector.extract_strided_slice %281 {offsets = [0, 128], sizes = [8, 16], strides = [1, 1]} : vector<8x192xf32> to vector<8x16xf32>
    %cst_92 = arith.constant dense<0.000000e+00> : vector<1x8xf32>
    %286 = tpu.matmul %283, %284, %cst_92 {dimension_numbers = #tpu.dot_dimension_numbers<[1], [1], [0], [0], [0, 0, 1, 0], [], []>} : vector<1x16xf32>, vector<8x16xf32>, vector<1x8xf32> -> vector<1x8xf32>
    %cst_93 = arith.constant 2.500000e-01 : f32
    %287 = vector.broadcast %cst_93 : f32 to vector<1x8xf32>
    %288 = arith.mulf %286, %287 : vector<1x8xf32>
    %289 = arith.addf %288, %282 : vector<1x8xf32>
    %cst_94 = arith.constant dense<0xFF800000> : vector<1xf32>
    %290 = vector.multi_reduction <maximumf>, %289, %cst_94 [1] : vector<1x8xf32> to vector<1xf32>
    %291 = vector.shape_cast %290 : vector<1xf32> to vector<1x1xf32>
    %292 = vector.broadcast %291 : vector<1x1xf32> to vector<1x8xf32>
    %293 = arith.subf %289, %292 : vector<1x8xf32>
    %294 = math.exp %293 : vector<1x8xf32>
    %cst_95 = arith.constant dense<0.000000e+00> : vector<1xf32>
    %295 = vector.multi_reduction <add>, %294, %cst_95 [1] : vector<1x8xf32> to vector<1xf32>
    %296 = vector.shape_cast %295 : vector<1xf32> to vector<1x1xf32>
    %297 = tpu.reciprocal %296 {approx = true} : vector<1x1xf32> -> vector<1x1xf32>
    %298 = vector.broadcast %297 : vector<1x1xf32> to vector<1x8xf32>
    %299 = arith.mulf %294, %298 : vector<1x8xf32>
    %cst_96 = arith.constant dense<0.000000e+00> : vector<1x16xf32>
    %300 = tpu.matmul %299, %285, %cst_96 {dimension_numbers = #tpu.dot_dimension_numbers<[1], [0], [0], [1], [0, 0, 1, 1], [], []>} : vector<1x8xf32>, vector<8x16xf32>, vector<1x16xf32> -> vector<1x16xf32>
    %301 = vector.extract_strided_slice %281 {offsets = [0, 16], sizes = [1, 16], strides = [1, 1]} : vector<8x192xf32> to vector<1x16xf32>
    %302 = vector.extract_strided_slice %281 {offsets = [0, 80], sizes = [8, 16], strides = [1, 1]} : vector<8x192xf32> to vector<8x16xf32>
    %303 = vector.extract_strided_slice %281 {offsets = [0, 144], sizes = [8, 16], strides = [1, 1]} : vector<8x192xf32> to vector<8x16xf32>
    %cst_97 = arith.constant dense<0.000000e+00> : vector<1x8xf32>
    %304 = tpu.matmul %301, %302, %cst_97 {dimension_numbers = #tpu.dot_dimension_numbers<[1], [1], [0], [0], [0, 0, 1, 0], [], []>} : vector<1x16xf32>, vector<8x16xf32>, vector<1x8xf32> -> vector<1x8xf32>
    %cst_98 = arith.constant 2.500000e-01 : f32
    %305 = vector.broadcast %cst_98 : f32 to vector<1x8xf32>
    %306 = arith.mulf %304, %305 : vector<1x8xf32>
    %307 = arith.addf %306, %282 : vector<1x8xf32>
    %cst_99 = arith.constant dense<0xFF800000> : vector<1xf32>
    %308 = vector.multi_reduction <maximumf>, %307, %cst_99 [1] : vector<1x8xf32> to vector<1xf32>
    %309 = vector.shape_cast %308 : vector<1xf32> to vector<1x1xf32>
    %310 = vector.broadcast %309 : vector<1x1xf32> to vector<1x8xf32>
    %311 = arith.subf %307, %310 : vector<1x8xf32>
    %312 = math.exp %311 : vector<1x8xf32>
    %cst_100 = arith.constant dense<0.000000e+00> : vector<1xf32>
    %313 = vector.multi_reduction <add>, %312, %cst_100 [1] : vector<1x8xf32> to vector<1xf32>
    %314 = vector.shape_cast %313 : vector<1xf32> to vector<1x1xf32>
    %315 = tpu.reciprocal %314 {approx = true} : vector<1x1xf32> -> vector<1x1xf32>
    %316 = vector.broadcast %315 : vector<1x1xf32> to vector<1x8xf32>
    %317 = arith.mulf %312, %316 : vector<1x8xf32>
    %cst_101 = arith.constant dense<0.000000e+00> : vector<1x16xf32>
    %318 = tpu.matmul %317, %303, %cst_101 {dimension_numbers = #tpu.dot_dimension_numbers<[1], [0], [0], [1], [0, 0, 1, 1], [], []>} : vector<1x8xf32>, vector<8x16xf32>, vector<1x16xf32> -> vector<1x16xf32>
    %319 = vector.extract_strided_slice %281 {offsets = [0, 32], sizes = [1, 16], strides = [1, 1]} : vector<8x192xf32> to vector<1x16xf32>
    %320 = vector.extract_strided_slice %281 {offsets = [0, 96], sizes = [8, 16], strides = [1, 1]} : vector<8x192xf32> to vector<8x16xf32>
    %321 = vector.extract_strided_slice %281 {offsets = [0, 160], sizes = [8, 16], strides = [1, 1]} : vector<8x192xf32> to vector<8x16xf32>
    %cst_102 = arith.constant dense<0.000000e+00> : vector<1x8xf32>
    %322 = tpu.matmul %319, %320, %cst_102 {dimension_numbers = #tpu.dot_dimension_numbers<[1], [1], [0], [0], [0, 0, 1, 0], [], []>} : vector<1x16xf32>, vector<8x16xf32>, vector<1x8xf32> -> vector<1x8xf32>
    %cst_103 = arith.constant 2.500000e-01 : f32
    %323 = vector.broadcast %cst_103 : f32 to vector<1x8xf32>
    %324 = arith.mulf %322, %323 : vector<1x8xf32>
    %325 = arith.addf %324, %282 : vector<1x8xf32>
    %cst_104 = arith.constant dense<0xFF800000> : vector<1xf32>
    %326 = vector.multi_reduction <maximumf>, %325, %cst_104 [1] : vector<1x8xf32> to vector<1xf32>
    %327 = vector.shape_cast %326 : vector<1xf32> to vector<1x1xf32>
    %328 = vector.broadcast %327 : vector<1x1xf32> to vector<1x8xf32>
    %329 = arith.subf %325, %328 : vector<1x8xf32>
    %330 = math.exp %329 : vector<1x8xf32>
    %cst_105 = arith.constant dense<0.000000e+00> : vector<1xf32>
    %331 = vector.multi_reduction <add>, %330, %cst_105 [1] : vector<1x8xf32> to vector<1xf32>
    %332 = vector.shape_cast %331 : vector<1xf32> to vector<1x1xf32>
    %333 = tpu.reciprocal %332 {approx = true} : vector<1x1xf32> -> vector<1x1xf32>
    %334 = vector.broadcast %333 : vector<1x1xf32> to vector<1x8xf32>
    %335 = arith.mulf %330, %334 : vector<1x8xf32>
    %cst_106 = arith.constant dense<0.000000e+00> : vector<1x16xf32>
    %336 = tpu.matmul %335, %321, %cst_106 {dimension_numbers = #tpu.dot_dimension_numbers<[1], [0], [0], [1], [0, 0, 1, 1], [], []>} : vector<1x8xf32>, vector<8x16xf32>, vector<1x16xf32> -> vector<1x16xf32>
    %337 = vector.extract_strided_slice %281 {offsets = [0, 48], sizes = [1, 16], strides = [1, 1]} : vector<8x192xf32> to vector<1x16xf32>
    %338 = vector.extract_strided_slice %281 {offsets = [0, 112], sizes = [8, 16], strides = [1, 1]} : vector<8x192xf32> to vector<8x16xf32>
    %339 = vector.extract_strided_slice %281 {offsets = [0, 176], sizes = [8, 16], strides = [1, 1]} : vector<8x192xf32> to vector<8x16xf32>
    %cst_107 = arith.constant dense<0.000000e+00> : vector<1x8xf32>
    %340 = tpu.matmul %337, %338, %cst_107 {dimension_numbers = #tpu.dot_dimension_numbers<[1], [1], [0], [0], [0, 0, 1, 0], [], []>} : vector<1x16xf32>, vector<8x16xf32>, vector<1x8xf32> -> vector<1x8xf32>
    %cst_108 = arith.constant 2.500000e-01 : f32
    %341 = vector.broadcast %cst_108 : f32 to vector<1x8xf32>
    %342 = arith.mulf %340, %341 : vector<1x8xf32>
    %343 = arith.addf %342, %282 : vector<1x8xf32>
    %cst_109 = arith.constant dense<0xFF800000> : vector<1xf32>
    %344 = vector.multi_reduction <maximumf>, %343, %cst_109 [1] : vector<1x8xf32> to vector<1xf32>
    %345 = vector.shape_cast %344 : vector<1xf32> to vector<1x1xf32>
    %346 = vector.broadcast %345 : vector<1x1xf32> to vector<1x8xf32>
    %347 = arith.subf %343, %346 : vector<1x8xf32>
    %348 = math.exp %347 : vector<1x8xf32>
    %cst_110 = arith.constant dense<0.000000e+00> : vector<1xf32>
    %349 = vector.multi_reduction <add>, %348, %cst_110 [1] : vector<1x8xf32> to vector<1xf32>
    %350 = vector.shape_cast %349 : vector<1xf32> to vector<1x1xf32>
    %351 = tpu.reciprocal %350 {approx = true} : vector<1x1xf32> -> vector<1x1xf32>
    %352 = vector.broadcast %351 : vector<1x1xf32> to vector<1x8xf32>
    %353 = arith.mulf %348, %352 : vector<1x8xf32>
    %cst_111 = arith.constant dense<0.000000e+00> : vector<1x16xf32>
    %354 = tpu.matmul %353, %339, %cst_111 {dimension_numbers = #tpu.dot_dimension_numbers<[1], [0], [0], [1], [0, 0, 1, 1], [], []>} : vector<1x8xf32>, vector<8x16xf32>, vector<1x16xf32> -> vector<1x16xf32>
    %355 = tpu.concatenate %300, %318, %336, %354 in 1 : vector<1x16xf32>, vector<1x16xf32>, vector<1x16xf32>, vector<1x16xf32> -> vector<1x64xf32>
    %356 = vector.extract_strided_slice %280 {offsets = [8, 0], sizes = [8, 192], strides = [1, 1]} : vector<16x192xf32> to vector<8x192xf32>
    %c1_112 = arith.constant 1 : index
    %c0_113 = arith.constant 0 : index
    %357 = vector.load %arg2[%c1_112, %c0_113] : memref<2x8xf32, #tpu.memory_space<vmem>>, vector<1x8xf32>
    %358 = vector.extract_strided_slice %356 {offsets = [0, 0], sizes = [1, 16], strides = [1, 1]} : vector<8x192xf32> to vector<1x16xf32>
    %359 = vector.extract_strided_slice %356 {offsets = [0, 64], sizes = [8, 16], strides = [1, 1]} : vector<8x192xf32> to vector<8x16xf32>
    %360 = vector.extract_strided_slice %356 {offsets = [0, 128], sizes = [8, 16], strides = [1, 1]} : vector<8x192xf32> to vector<8x16xf32>
    %cst_114 = arith.constant dense<0.000000e+00> : vector<1x8xf32>
    %361 = tpu.matmul %358, %359, %cst_114 {dimension_numbers = #tpu.dot_dimension_numbers<[1], [1], [0], [0], [0, 0, 1, 0], [], []>} : vector<1x16xf32>, vector<8x16xf32>, vector<1x8xf32> -> vector<1x8xf32>
    %cst_115 = arith.constant 2.500000e-01 : f32
    %362 = vector.broadcast %cst_115 : f32 to vector<1x8xf32>
    %363 = arith.mulf %361, %362 : vector<1x8xf32>
    %364 = arith.addf %363, %357 : vector<1x8xf32>
    %cst_116 = arith.constant dense<0xFF800000> : vector<1xf32>
    %365 = vector.multi_reduction <maximumf>, %364, %cst_116 [1] : vector<1x8xf32> to vector<1xf32>
    %366 = vector.shape_cast %365 : vector<1xf32> to vector<1x1xf32>
    %367 = vector.broadcast %366 : vector<1x1xf32> to vector<1x8xf32>
    %368 = arith.subf %364, %367 : vector<1x8xf32>
    %369 = math.exp %368 : vector<1x8xf32>
    %cst_117 = arith.constant dense<0.000000e+00> : vector<1xf32>
    %370 = vector.multi_reduction <add>, %369, %cst_117 [1] : vector<1x8xf32> to vector<1xf32>
    %371 = vector.shape_cast %370 : vector<1xf32> to vector<1x1xf32>
    %372 = tpu.reciprocal %371 {approx = true} : vector<1x1xf32> -> vector<1x1xf32>
    %373 = vector.broadcast %372 : vector<1x1xf32> to vector<1x8xf32>
    %374 = arith.mulf %369, %373 : vector<1x8xf32>
    %cst_118 = arith.constant dense<0.000000e+00> : vector<1x16xf32>
    %375 = tpu.matmul %374, %360, %cst_118 {dimension_numbers = #tpu.dot_dimension_numbers<[1], [0], [0], [1], [0, 0, 1, 1], [], []>} : vector<1x8xf32>, vector<8x16xf32>, vector<1x16xf32> -> vector<1x16xf32>
    %376 = vector.extract_strided_slice %356 {offsets = [0, 16], sizes = [1, 16], strides = [1, 1]} : vector<8x192xf32> to vector<1x16xf32>
    %377 = vector.extract_strided_slice %356 {offsets = [0, 80], sizes = [8, 16], strides = [1, 1]} : vector<8x192xf32> to vector<8x16xf32>
    %378 = vector.extract_strided_slice %356 {offsets = [0, 144], sizes = [8, 16], strides = [1, 1]} : vector<8x192xf32> to vector<8x16xf32>
    %cst_119 = arith.constant dense<0.000000e+00> : vector<1x8xf32>
    %379 = tpu.matmul %376, %377, %cst_119 {dimension_numbers = #tpu.dot_dimension_numbers<[1], [1], [0], [0], [0, 0, 1, 0], [], []>} : vector<1x16xf32>, vector<8x16xf32>, vector<1x8xf32> -> vector<1x8xf32>
    %cst_120 = arith.constant 2.500000e-01 : f32
    %380 = vector.broadcast %cst_120 : f32 to vector<1x8xf32>
    %381 = arith.mulf %379, %380 : vector<1x8xf32>
    %382 = arith.addf %381, %357 : vector<1x8xf32>
    %cst_121 = arith.constant dense<0xFF800000> : vector<1xf32>
    %383 = vector.multi_reduction <maximumf>, %382, %cst_121 [1] : vector<1x8xf32> to vector<1xf32>
    %384 = vector.shape_cast %383 : vector<1xf32> to vector<1x1xf32>
    %385 = vector.broadcast %384 : vector<1x1xf32> to vector<1x8xf32>
    %386 = arith.subf %382, %385 : vector<1x8xf32>
    %387 = math.exp %386 : vector<1x8xf32>
    %cst_122 = arith.constant dense<0.000000e+00> : vector<1xf32>
    %388 = vector.multi_reduction <add>, %387, %cst_122 [1] : vector<1x8xf32> to vector<1xf32>
    %389 = vector.shape_cast %388 : vector<1xf32> to vector<1x1xf32>
    %390 = tpu.reciprocal %389 {approx = true} : vector<1x1xf32> -> vector<1x1xf32>
    %391 = vector.broadcast %390 : vector<1x1xf32> to vector<1x8xf32>
    %392 = arith.mulf %387, %391 : vector<1x8xf32>
    %cst_123 = arith.constant dense<0.000000e+00> : vector<1x16xf32>
    %393 = tpu.matmul %392, %378, %cst_123 {dimension_numbers = #tpu.dot_dimension_numbers<[1], [0], [0], [1], [0, 0, 1, 1], [], []>} : vector<1x8xf32>, vector<8x16xf32>, vector<1x16xf32> -> vector<1x16xf32>
    %394 = vector.extract_strided_slice %356 {offsets = [0, 32], sizes = [1, 16], strides = [1, 1]} : vector<8x192xf32> to vector<1x16xf32>
    %395 = vector.extract_strided_slice %356 {offsets = [0, 96], sizes = [8, 16], strides = [1, 1]} : vector<8x192xf32> to vector<8x16xf32>
    %396 = vector.extract_strided_slice %356 {offsets = [0, 160], sizes = [8, 16], strides = [1, 1]} : vector<8x192xf32> to vector<8x16xf32>
    %cst_124 = arith.constant dense<0.000000e+00> : vector<1x8xf32>
    %397 = tpu.matmul %394, %395, %cst_124 {dimension_numbers = #tpu.dot_dimension_numbers<[1], [1], [0], [0], [0, 0, 1, 0], [], []>} : vector<1x16xf32>, vector<8x16xf32>, vector<1x8xf32> -> vector<1x8xf32>
    %cst_125 = arith.constant 2.500000e-01 : f32
    %398 = vector.broadcast %cst_125 : f32 to vector<1x8xf32>
    %399 = arith.mulf %397, %398 : vector<1x8xf32>
    %400 = arith.addf %399, %357 : vector<1x8xf32>
    %cst_126 = arith.constant dense<0xFF800000> : vector<1xf32>
    %401 = vector.multi_reduction <maximumf>, %400, %cst_126 [1] : vector<1x8xf32> to vector<1xf32>
    %402 = vector.shape_cast %401 : vector<1xf32> to vector<1x1xf32>
    %403 = vector.broadcast %402 : vector<1x1xf32> to vector<1x8xf32>
    %404 = arith.subf %400, %403 : vector<1x8xf32>
    %405 = math.exp %404 : vector<1x8xf32>
    %cst_127 = arith.constant dense<0.000000e+00> : vector<1xf32>
    %406 = vector.multi_reduction <add>, %405, %cst_127 [1] : vector<1x8xf32> to vector<1xf32>
    %407 = vector.shape_cast %406 : vector<1xf32> to vector<1x1xf32>
    %408 = tpu.reciprocal %407 {approx = true} : vector<1x1xf32> -> vector<1x1xf32>
    %409 = vector.broadcast %408 : vector<1x1xf32> to vector<1x8xf32>
    %410 = arith.mulf %405, %409 : vector<1x8xf32>
    %cst_128 = arith.constant dense<0.000000e+00> : vector<1x16xf32>
    %411 = tpu.matmul %410, %396, %cst_128 {dimension_numbers = #tpu.dot_dimension_numbers<[1], [0], [0], [1], [0, 0, 1, 1], [], []>} : vector<1x8xf32>, vector<8x16xf32>, vector<1x16xf32> -> vector<1x16xf32>
    %412 = vector.extract_strided_slice %356 {offsets = [0, 48], sizes = [1, 16], strides = [1, 1]} : vector<8x192xf32> to vector<1x16xf32>
    %413 = vector.extract_strided_slice %356 {offsets = [0, 112], sizes = [8, 16], strides = [1, 1]} : vector<8x192xf32> to vector<8x16xf32>
    %414 = vector.extract_strided_slice %356 {offsets = [0, 176], sizes = [8, 16], strides = [1, 1]} : vector<8x192xf32> to vector<8x16xf32>
    %cst_129 = arith.constant dense<0.000000e+00> : vector<1x8xf32>
    %415 = tpu.matmul %412, %413, %cst_129 {dimension_numbers = #tpu.dot_dimension_numbers<[1], [1], [0], [0], [0, 0, 1, 0], [], []>} : vector<1x16xf32>, vector<8x16xf32>, vector<1x8xf32> -> vector<1x8xf32>
    %cst_130 = arith.constant 2.500000e-01 : f32
    %416 = vector.broadcast %cst_130 : f32 to vector<1x8xf32>
    %417 = arith.mulf %415, %416 : vector<1x8xf32>
    %418 = arith.addf %417, %357 : vector<1x8xf32>
    %cst_131 = arith.constant dense<0xFF800000> : vector<1xf32>
    %419 = vector.multi_reduction <maximumf>, %418, %cst_131 [1] : vector<1x8xf32> to vector<1xf32>
    %420 = vector.shape_cast %419 : vector<1xf32> to vector<1x1xf32>
    %421 = vector.broadcast %420 : vector<1x1xf32> to vector<1x8xf32>
    %422 = arith.subf %418, %421 : vector<1x8xf32>
    %423 = math.exp %422 : vector<1x8xf32>
    %cst_132 = arith.constant dense<0.000000e+00> : vector<1xf32>
    %424 = vector.multi_reduction <add>, %423, %cst_132 [1] : vector<1x8xf32> to vector<1xf32>
    %425 = vector.shape_cast %424 : vector<1xf32> to vector<1x1xf32>
    %426 = tpu.reciprocal %425 {approx = true} : vector<1x1xf32> -> vector<1x1xf32>
    %427 = vector.broadcast %426 : vector<1x1xf32> to vector<1x8xf32>
    %428 = arith.mulf %423, %427 : vector<1x8xf32>
    %cst_133 = arith.constant dense<0.000000e+00> : vector<1x16xf32>
    %429 = tpu.matmul %428, %414, %cst_133 {dimension_numbers = #tpu.dot_dimension_numbers<[1], [0], [0], [1], [0, 0, 1, 1], [], []>} : vector<1x8xf32>, vector<8x16xf32>, vector<1x16xf32> -> vector<1x16xf32>
    %430 = tpu.concatenate %375, %393, %411, %429 in 1 : vector<1x16xf32>, vector<1x16xf32>, vector<1x16xf32>, vector<1x16xf32> -> vector<1x64xf32>
    %431 = tpu.concatenate %355, %430 in 0 : vector<1x64xf32>, vector<1x64xf32> -> vector<2x64xf32>
    %432 = vector.extract_strided_slice %271 {offsets = [0, 0], sizes = [1, 64], strides = [1, 1]} : vector<16x64xf32> to vector<1x64xf32>
    %433 = vector.extract_strided_slice %271 {offsets = [8, 0], sizes = [1, 64], strides = [1, 1]} : vector<16x64xf32> to vector<1x64xf32>
    %434 = tpu.concatenate %432, %433 in 0 : vector<1x64xf32>, vector<1x64xf32> -> vector<2x64xf32>
    %435 = arith.truncf %431 : vector<2x64xf32> to vector<2x64xbf16>
    %c1_134 = arith.constant 1 : index
    %c0_135 = arith.constant 0 : index
    %c0_136 = arith.constant 0 : index
    %436 = vector.load %arg5[%c1_134, %c0_135, %c0_136] : memref<2x64x64xbf16, #tpu.memory_space<vmem>>, vector<1x64x64xbf16>
    %437 = vector.shape_cast %436 : vector<1x64x64xbf16> to vector<64x64xbf16>
    %cst_137 = arith.constant dense<0.000000e+00> : vector<2x64xf32>
    %438 = tpu.matmul %435, %437, %cst_137 {dimension_numbers = #tpu.dot_dimension_numbers<[1], [0], [0], [1], [0, 0, 1, 1], [], []>} : vector<2x64xbf16>, vector<64x64xbf16>, vector<2x64xf32> -> vector<2x64xf32>
    %439 = vector.extract_strided_slice %273 {offsets = [1, 0], sizes = [1, 64], strides = [1, 1]} : vector<8x192xf32> to vector<1x64xf32>
    %440 = vector.broadcast %439 : vector<1x64xf32> to vector<2x64xf32>
    %441 = arith.addf %438, %440 : vector<2x64xf32>
    %442 = arith.addf %434, %441 : vector<2x64xf32>
    %443 = vector.extract_strided_slice %273 {offsets = [2, 0], sizes = [1, 64], strides = [1, 1]} : vector<8x192xf32> to vector<1x64xf32>
    %444 = vector.extract_strided_slice %273 {offsets = [3, 0], sizes = [1, 64], strides = [1, 1]} : vector<8x192xf32> to vector<1x64xf32>
    %cst_138 = arith.constant dense<0.000000e+00> : vector<2xf32>
    %445 = vector.multi_reduction <add>, %442, %cst_138 [1] : vector<2x64xf32> to vector<2xf32>
    %446 = vector.shape_cast %445 : vector<2xf32> to vector<2x1xf32>
    %cst_139 = arith.constant 6.400000e+01 : f32
    %447 = vector.broadcast %cst_139 : f32 to vector<2x1xf32>
    %448 = arith.divf %446, %447 : vector<2x1xf32>
    %449 = vector.broadcast %448 : vector<2x1xf32> to vector<2x64xf32>
    %450 = arith.subf %442, %449 : vector<2x64xf32>
    %451 = arith.mulf %450, %450 : vector<2x64xf32>
    %cst_140 = arith.constant dense<0.000000e+00> : vector<2xf32>
    %452 = vector.multi_reduction <add>, %451, %cst_140 [1] : vector<2x64xf32> to vector<2xf32>
    %453 = vector.shape_cast %452 : vector<2xf32> to vector<2x1xf32>
    %cst_141 = arith.constant 6.400000e+01 : f32
    %454 = vector.broadcast %cst_141 : f32 to vector<2x1xf32>
    %455 = arith.divf %453, %454 : vector<2x1xf32>
    %cst_142 = arith.constant 9.99999996E-13 : f32
    %456 = vector.broadcast %cst_142 : f32 to vector<2x1xf32>
    %457 = arith.addf %455, %456 : vector<2x1xf32>
    %458 = math.rsqrt %457 : vector<2x1xf32>
    %459 = vector.broadcast %458 : vector<2x1xf32> to vector<2x64xf32>
    %460 = arith.mulf %450, %459 : vector<2x64xf32>
    %461 = vector.broadcast %443 : vector<1x64xf32> to vector<2x64xf32>
    %462 = arith.mulf %460, %461 : vector<2x64xf32>
    %463 = vector.broadcast %444 : vector<1x64xf32> to vector<2x64xf32>
    %464 = arith.addf %462, %463 : vector<2x64xf32>
    %465 = arith.truncf %464 : vector<2x64xf32> to vector<2x64xbf16>
    %c1_143 = arith.constant 1 : index
    %c0_144 = arith.constant 0 : index
    %c0_145 = arith.constant 0 : index
    %466 = vector.load %arg6[%c1_143, %c0_144, %c0_145] : memref<2x64x128xbf16, #tpu.memory_space<vmem>>, vector<1x64x128xbf16>
    %467 = vector.shape_cast %466 : vector<1x64x128xbf16> to vector<64x128xbf16>
    %cst_146 = arith.constant dense<0.000000e+00> : vector<2x128xf32>
    %468 = tpu.matmul %465, %467, %cst_146 {dimension_numbers = #tpu.dot_dimension_numbers<[1], [0], [0], [1], [0, 0, 1, 1], [], []>} : vector<2x64xbf16>, vector<64x128xbf16>, vector<2x128xf32> -> vector<2x128xf32>
    %469 = vector.extract_strided_slice %273 {offsets = [4, 0], sizes = [1, 128], strides = [1, 1]} : vector<8x192xf32> to vector<1x128xf32>
    %470 = vector.broadcast %469 : vector<1x128xf32> to vector<2x128xf32>
    %471 = arith.addf %468, %470 : vector<2x128xf32>
    %cst_147 = arith.constant 5.000000e-01 : f32
    %472 = vector.broadcast %cst_147 : f32 to vector<2x128xf32>
    %473 = arith.mulf %472, %471 : vector<2x128xf32>
    %cst_148 = arith.constant 4.471500e-02 : f32
    %474 = vector.broadcast %cst_148 : f32 to vector<2x128xf32>
    %475 = arith.mulf %474, %471 : vector<2x128xf32>
    %476 = arith.mulf %475, %471 : vector<2x128xf32>
    %477 = arith.mulf %476, %471 : vector<2x128xf32>
    %478 = arith.addf %471, %477 : vector<2x128xf32>
    %cst_149 = arith.constant 0.797884583 : f32
    %479 = vector.broadcast %cst_149 : f32 to vector<2x128xf32>
    %480 = arith.mulf %479, %478 : vector<2x128xf32>
    %481 = math.tanh %480 : vector<2x128xf32>
    %cst_150 = arith.constant 1.000000e+00 : f32
    %482 = vector.broadcast %cst_150 : f32 to vector<2x128xf32>
    %483 = arith.addf %482, %481 : vector<2x128xf32>
    %484 = arith.mulf %473, %483 : vector<2x128xf32>
    %485 = arith.truncf %484 : vector<2x128xf32> to vector<2x128xbf16>
    %c1_151 = arith.constant 1 : index
    %c0_152 = arith.constant 0 : index
    %c0_153 = arith.constant 0 : index
    %486 = vector.load %arg7[%c1_151, %c0_152, %c0_153] : memref<2x128x64xbf16, #tpu.memory_space<vmem>>, vector<1x128x64xbf16>
    %487 = vector.shape_cast %486 : vector<1x128x64xbf16> to vector<128x64xbf16>
    %cst_154 = arith.constant dense<0.000000e+00> : vector<2x64xf32>
    %488 = tpu.matmul %485, %487, %cst_154 {dimension_numbers = #tpu.dot_dimension_numbers<[1], [0], [0], [1], [0, 0, 1, 1], [], []>} : vector<2x128xbf16>, vector<128x64xbf16>, vector<2x64xf32> -> vector<2x64xf32>
    %489 = vector.extract_strided_slice %273 {offsets = [5, 0], sizes = [1, 64], strides = [1, 1]} : vector<8x192xf32> to vector<1x64xf32>
    %490 = vector.broadcast %489 : vector<1x64xf32> to vector<2x64xf32>
    %491 = arith.addf %488, %490 : vector<2x64xf32>
    %492 = arith.addf %464, %491 : vector<2x64xf32>
    %493 = vector.extract_strided_slice %273 {offsets = [6, 0], sizes = [1, 64], strides = [1, 1]} : vector<8x192xf32> to vector<1x64xf32>
    %494 = vector.extract_strided_slice %273 {offsets = [7, 0], sizes = [1, 64], strides = [1, 1]} : vector<8x192xf32> to vector<1x64xf32>
    %cst_155 = arith.constant dense<0.000000e+00> : vector<2xf32>
    %495 = vector.multi_reduction <add>, %492, %cst_155 [1] : vector<2x64xf32> to vector<2xf32>
    %496 = vector.shape_cast %495 : vector<2xf32> to vector<2x1xf32>
    %cst_156 = arith.constant 6.400000e+01 : f32
    %497 = vector.broadcast %cst_156 : f32 to vector<2x1xf32>
    %498 = arith.divf %496, %497 : vector<2x1xf32>
    %499 = vector.broadcast %498 : vector<2x1xf32> to vector<2x64xf32>
    %500 = arith.subf %492, %499 : vector<2x64xf32>
    %501 = arith.mulf %500, %500 : vector<2x64xf32>
    %cst_157 = arith.constant dense<0.000000e+00> : vector<2xf32>
    %502 = vector.multi_reduction <add>, %501, %cst_157 [1] : vector<2x64xf32> to vector<2xf32>
    %503 = vector.shape_cast %502 : vector<2xf32> to vector<2x1xf32>
    %cst_158 = arith.constant 6.400000e+01 : f32
    %504 = vector.broadcast %cst_158 : f32 to vector<2x1xf32>
    %505 = arith.divf %503, %504 : vector<2x1xf32>
    %cst_159 = arith.constant 9.99999996E-13 : f32
    %506 = vector.broadcast %cst_159 : f32 to vector<2x1xf32>
    %507 = arith.addf %505, %506 : vector<2x1xf32>
    %508 = math.rsqrt %507 : vector<2x1xf32>
    %509 = vector.broadcast %508 : vector<2x1xf32> to vector<2x64xf32>
    %510 = arith.mulf %500, %509 : vector<2x64xf32>
    %511 = vector.broadcast %493 : vector<1x64xf32> to vector<2x64xf32>
    %512 = arith.mulf %510, %511 : vector<2x64xf32>
    %513 = vector.broadcast %494 : vector<1x64xf32> to vector<2x64xf32>
    %514 = arith.addf %512, %513 : vector<2x64xf32>
    %c0_160 = arith.constant 0 : index
    %c0_161 = arith.constant 0 : index
    %515 = vector.load %arg9[%c0_160, %c0_161] : memref<2x64xf32, #tpu.memory_space<vmem>>, vector<2x64xf32>
    tpu.vector_store %arg9[%c0_160, %c0_161], %514 {strides = array<i32>} : memref<2x64xf32, #tpu.memory_space<vmem>>, vector<2x64xf32>,
    return
  }
  func.func @transform_0(%arg0: i32) -> (i32, i32) {
    %c0_i32 = arith.constant 0 : i32
    %c0_i32_0 = arith.constant 0 : i32
    %c0_i32_1 = arith.constant 0 : i32
    return %c0_i32, %c0_i32_0 : i32, i32
  }
  func.func @transform_1(%arg0: i32) -> (i32, i32) {
    %c0_i32 = arith.constant 0 : i32
    %c0_i32_0 = arith.constant 0 : i32
    %c0_i32_1 = arith.constant 0 : i32
    return %c0_i32, %c0_i32_0 : i32, i32
  }
  func.func @transform_2(%arg0: i32) -> (i32, i32) {
    %c0_i32 = arith.constant 0 : i32
    %c0_i32_0 = arith.constant 0 : i32
    %c0_i32_1 = arith.constant 0 : i32
    return %c0_i32, %c0_i32_0 : i32, i32
  }
  func.func @transform_3(%arg0: i32) -> (i32, i32, i32) {
    %c0_i32 = arith.constant 0 : i32
    %c0_i32_0 = arith.constant 0 : i32
    %c0_i32_1 = arith.constant 0 : i32
    %c0_i32_2 = arith.constant 0 : i32
    return %c0_i32, %c0_i32_0, %c0_i32_1 : i32, i32, i32
  }
  func.func @transform_4(%arg0: i32) -> (i32, i32, i32) {
    %c0_i32 = arith.constant 0 : i32
    %c0_i32_0 = arith.constant 0 : i32
    %c0_i32_1 = arith.constant 0 : i32
    %c0_i32_2 = arith.constant 0 : i32
    return %c0_i32, %c0_i32_0, %c0_i32_1 : i32, i32, i32
  }
  func.func @transform_5(%arg0: i32) -> (i32, i32, i32) {
    %c0_i32 = arith.constant 0 : i32
    %c0_i32_0 = arith.constant 0 : i32
    %c0_i32_1 = arith.constant 0 : i32
    %c0_i32_2 = arith.constant 0 : i32
    return %c0_i32, %c0_i32_0, %c0_i32_1 : i32, i32, i32
  }
  func.func @transform_6(%arg0: i32) -> (i32, i32, i32) {
    %c0_i32 = arith.constant 0 : i32
    %c0_i32_0 = arith.constant 0 : i32
    %c0_i32_1 = arith.constant 0 : i32
    %c0_i32_2 = arith.constant 0 : i32
    return %c0_i32, %c0_i32_0, %c0_i32_1 : i32, i32, i32
  }
  func.func @transform_7(%arg0: i32) -> (i32, i32, i32) {
    %c0_i32 = arith.constant 0 : i32
    %c0_i32_0 = arith.constant 0 : i32
    %c0_i32_1 = arith.constant 0 : i32
    %c0_i32_2 = arith.constant 0 : i32
    return %c0_i32, %c0_i32_0, %c0_i32_1 : i32, i32, i32
  }
  func.func @transform_8(%arg0: i32) -> (i32, i32) {
    %c0_i32 = arith.constant 0 : i32
    %c0_i32_0 = arith.constant 0 : i32
    %c0_i32_1 = arith.constant 0 : i32
    return %c0_i32, %c0_i32_0 : i32, i32
  }
}

</mosaic_0001>

<bundles_post_ra>
// kernel: tpu_custom_call.1
= control target key start
LH: loop header
LB: loop body
LE: loop exit
PB: predicated region body
PF: predicated region fallthrough
CT: control target
= control target key end

     0   :  { %13 = vsyncpa [#allocation3], 0  ;;  %s5296_s0 = inlined_call_operand.hbm [shape: f32[16,64], index: 0, kind: input, shape index: {}]   ;;  %s5297_s1 = inlined_call_operand.vmem [shape: f32[2,8], index: 1, kind: input, shape index: {}]   ;;  %s5298_s2 = inlined_call_operand.vmem [shape: f32[2,64], index: 2, kind: input, shape index: {}]   ;;  %s5299_s3 = inlined_call_operand.vmem [shape: bf16[2,64,192], index: 3, kind: input, shape index: {}]   ;;  %s5300_s4 = inlined_call_operand.vmem [shape: bf16[2,64,64], index: 4, kind: input, shape index: {}]   ;;  %s5301_s5 = inlined_call_operand.hbm [shape: bf16[2,64,128], index: 5, kind: input, shape index: {}]   ;;  %s5302_s6 = inlined_call_operand.vmem [shape: bf16[2,128,64], index: 6, kind: input, shape index: {}]   ;;  %s5303_s7 = inlined_call_operand.hbm [shape: f32[2,8,192], index: 7, kind: input, shape index: {}]   ;;  %s5304_s8 = inlined_call_operand.hbm [shape: f32[2,64], index: 8, kind: output, shape index: {}]  }
   0x1   :  { %14 = vsyncpa [#allocation6], 0 }
   0x2   :  { %15 = vsyncpa [#allocation4], 0  ;;  %s4553_s27 = smov [#allocation5]   ;;  %s4459_s9 = scalar_lea.hbm %s5301_s5, 1024 }
   0x3   :  { %s41_s28 = sshll.u32 %s4553_s27, 4  ;;  %p4460_p0 = scmp.ne.s32.totalorder %s5301_s5, %s4459_s9  ;;  %s42_s28 = int_to_ptr.vmem [resolvable:$true] %s41_s28 }
   0x4   :  { %p4463_p1 = scmp.lt.u32.totalorder %s4459_s9, %s5301_s5 }
   0x6   :  { %p4465_p2 = pnand %p4463_p1, %p4460_p0 }
   0x8   :  { %4468 = shalt.err (!%p4465_p2)
}
   0x9   :  { %s4469_s14 = scalar_lea.vmem %s42_s28, 1024  ;;  %p4474_p4 = scmp.lt.s32.totalorder %s42_s28, %s42_s28 }
   0xa   :  { %p4470_p3 = scmp.ne.s32.totalorder %s42_s28, %s4469_s14  ;;  %p4475_p5 = scmp.lt.s32.totalorder %s4469_s14, %s4469_s14 }
   0xc   :  { %p4476_p6 = por %p4475_p5, %p4474_p4 }
   0xe   :  { %p4477_p7 = pnand %p4476_p6, %p4470_p3 }
  0x10   :  { %4480 = shalt.err (!%p4477_p7)
}
  0x11   :  { %s4554_s15 = smov 64   ;;  %s4555_s16 = smov 4  }
  0x12   :  { %47 = dma.hbm_to_vmem [thread:$0]  %s5301_s5, 1024, %s42_s28, [#allocation6], %s4554_s15, %s4554_s15, %s4555_s16  }
  0x13   :  { %s4556_s19 = smov [#allocation2]   ;;  %s4481_s23 = scalar_lea.hbm %s5296_s0, 256 }
  0x14   :  { %s21_s20 = sshll.u32 %s4556_s19, 4  ;;  %p4482_p8 = scmp.ne.s32.totalorder %s5296_s0, %s4481_s23  ;;  %s22_s20 = int_to_ptr.vmem [resolvable:$true] %s21_s20 }
  0x15   :  { %p4485_p9 = scmp.lt.u32.totalorder %s4481_s23, %s5296_s0 }
  0x17   :  { %p4487_p10 = pnand %p4485_p9, %p4482_p8 }
  0x19   :  { %4490 = shalt.err (!%p4487_p10)
}
  0x1a   :  { %s4491_s29 = scalar_lea.vmem %s22_s20, 256  ;;  %p4496_p12 = scmp.lt.s32.totalorder %s22_s20, %s22_s20 }
  0x1b   :  { %p4492_p11 = scmp.ne.s32.totalorder %s22_s20, %s4491_s29  ;;  %p4497_p13 = scmp.lt.s32.totalorder %s4491_s29, %s4491_s29 }
  0x1d   :  { %p4498_p0 = por %p4497_p13, %p4496_p12 }
  0x1f   :  { %p4499_p1 = pnand %p4498_p0, %p4492_p11 }
  0x21   :  { %4502 = shalt.err (!%p4499_p1)
}
  0x22   :  { %s4557_s5 = smov 128   ;;  %s4558_s28 = smov 8  }
  0x23   :  { %27 = dma.hbm_to_vmem [thread:$0]  %s5296_s0, 256, %s22_s20, [#allocation3], %s4557_s5, %s4557_s5, %s4558_s28  }
  0x24   :  { %s4559_s10 = smov [#allocation7]   ;;  %s4503_s14 = scalar_lea.hbm %s5303_s7, 512 }
  0x25   :  { %s55_s11 = sshll.u32 %s4559_s10, 4  ;;  %p4504_p2 = scmp.ne.s32.totalorder %s5303_s7, %s4503_s14  ;;  %s56_s11 = int_to_ptr.vmem [resolvable:$true] %s55_s11 }
  0x26   :  { %p4507_p3 = scmp.lt.u32.totalorder %s4503_s14, %s5303_s7 }
  0x28   :  { %p4509_p4 = pnand %p4507_p3, %p4504_p2 }
  0x2a   :  { %4512 = shalt.err (!%p4509_p4)
}
  0x2b   :  { %s4513_s21 = scalar_lea.vmem %s56_s11, 512  ;;  %p4518_p6 = scmp.lt.s32.totalorder %s56_s11, %s56_s11 }
  0x2c   :  { %p4514_p5 = scmp.ne.s32.totalorder %s56_s11, %s4513_s21  ;;  %p4519_p7 = scmp.lt.s32.totalorder %s4513_s21, %s4513_s21 }
  0x2e   :  { %p4520_p8 = por %p4519_p7, %p4518_p6 }
  0x30   :  { %p4521_p9 = pnand %p4520_p8, %p4514_p5 }
  0x32   :  { %4524 = shalt.err (!%p4521_p9)
}
  0x33   :  { %s4560_s0 = smov 256   ;;  %s4561_s20 = smov 16  }
  0x34   :  { %61 = dma.hbm_to_vmem [thread:$0]  %s5303_s7, 512, %s56_s11, [#allocation6], %s4560_s0, %s4560_s0, %s4561_s20  }
  0x35   :  { %4547 = dma.done.wait [#allocation3], 256  }
  0x36   :  { %4548 = vsyncadd [#allocation3], 4294967040 }
  0x37   :  { %4549 = dma.done.wait [#allocation6], 1536  }
  0x38   :  { %4550 = vsyncadd [#allocation6], 4294965760  ;;  %vm75_vm0 = vcmask 523264   ;;  %v73_v0 = vld [vmem:[#allocation2] sm:$0xff]  ;;  %v74_v1 = vld [vmem:[#allocation2 + $0x8] sm:$0xff]  ;;  %v4562_v22 = vmov 0   ;;  %v103_v27 = vlaneseq }
  0x39   :  { %v76_v2 = vsel %vm75_vm0, %v73_v0, 0.0  ;;  %v79_v3 = vsel %vm75_vm0, %v74_v1, 0.0  ;;  %v4315_v14 = vld [vmem:[%s5299_s3 + $0x4] ss:$8 sps:$4 sm:$0xff]   ;;  %v4317_v15 = vld [vmem:[%s5299_s3] ss:$8 sps:$4 sm:$0xff]   ;;  %209 = vmatprep.mubr.bf16.mxu0 %v4562_v22 }
  0x3a   :  { %77 = vadd.xlane.f32.xlu0 %v76_v2  ;;  %177 = vmatprep.subr.bf16.mxu0 %v4315_v14  ;;  %v4318_v16 = vld [vmem:[%s5299_s3 + $0x14] ss:$8 sps:$4 sm:$0xff]   ;;  %v4320_v17 = vld [vmem:[%s5299_s3 + $0x10] ss:$8 sps:$4 sm:$0xff]   ;;  %v4321_v18 = vld [vmem:[%s5299_s3 + $0x24] ss:$8 sps:$4 sm:$0xff]  }
  0x3b   :  { %178 = vmatpush1.bf16.msra.mxu0 %v4317_v15  ;;  %v4323_v19 = vld [vmem:[%s5299_s3 + $0x20] ss:$8 sps:$4 sm:$0xff]   ;;  %v4324_v20 = vld [vmem:[%s5299_s3 + $0x34] ss:$8 sps:$4 sm:$0xff]   ;;  %v4326_v21 = vld [vmem:[%s5299_s3 + $0x30] ss:$8 sps:$4 sm:$0xff]  }
  0x3c   :  { %179 = vmatprep.subr.bf16.mxu0 %v4318_v16  ;;  %v4684_v30 = vshrl.u32 %v103_v27, 7  ;;  %v72_v32 = vld [vmem:[%s5298_s2] sm:$0x3]  ;;  %v4563_v45 = vmov 0.0   ;;  %vm4564_vm1 = vmmov 0   ;;  %v4710_v46 = vld [vmem:[#allocation7] sm:$0xff] }
  0x3d   :  { %4024 = vmatprep.subr.mxu1 %v4563_v45  ;;  %4026 = vmatprep.mubr.msk.f32.mxu1 %vm4564_vm1, %v4563_v45  ;;  %v116_v48 = vld [vmem:[#allocation7 + $0x8] sm:$0xff]  ;;  %s4565_s2 = smov 112   ;;  %vm224_vm2 = vcmask 130048   ;;  %v4738_v59 = vld [vmem:[%s5297_s1] ss:$0 sm:$0xff]  ;;  %vm305_vm3 = vcmask 64512  }
  0x3e   :  { %80 = vadd.xlane.f32.xlu0 %v79_v3  ;;  %v4687_v31 = vsub.s32 0, %v4684_v30  ;;  %v4694_v36 = vsub.s32 1, %v4684_v30  ;;  %s4566_s0 = smov 48   ;;  %s4567_s22 = smov 32   ;;  %vm905_vm4 = vcmask 261120   ;;  %vm907_vm5 = vcmask 392192  }
  0x3f   :  { %180 = vmatpush1.bf16.msra.mxu0 %v4320_v17  ;;  %s4568_s23 = smov 96   ;;  %s4569_s7 = smov 80   ;;  %vm3435_vm6 = vcmask 1040384   ;;  %vm2150_vm7 = vcmask 57344   ;;  %vm3523_vm8 = vcmask 517120  }
  0x40   :  { %181 = vmatprep.subr.bf16.mxu0 %v4321_v18  ;;  %v106_v35 = vrot.slane %v72_v32, %v4687_v31  ;;  %v112_v40 = vrot.slane %v72_v32, %v4694_v36  ;;  %v129_v47 = vrot.slane %v4710_v46, %v4687_v31  ;;  %v133_v52 = vrot.slane %v116_v48, %v4687_v31 }
  0x43   :  { %182 = vmatpush1.bf16.msra.mxu0 %v4323_v19 }
  0x44   :  { %183 = vmatprep.subr.bf16.mxu0 %v4324_v20 }
  0x47   :  { %184 = vmatpush1.bf16.msra.mxu0 %v4326_v21 }
  0x48   :  { %4049 = vmatprep.subr.mxu0 %v4563_v45 }
  0xc7   :  { %v78_v4 = vpop.xlane.xlu0 %77 }
  0xc8   :  { %v83_v5 = vmul.f32 0.015625, %v78_v4 }
  0xca   :  { %v85_v6 = vsub.f32 %v73_v0, %v83_v5 }
  0xcb   :  { %v81_v7 = vpop.xlane.xlu0 %80 }
  0xcc   :  { %v84_v8 = vmul.f32 0.015625, %v81_v7  ;;  %v87_v9 = vmul.f32 %v85_v6, %v85_v6 }
  0xce   :  { %v86_v10 = vsub.f32 %v74_v1, %v84_v8  ;;  %v89_v11 = vsel %vm75_vm0, %v87_v9, 0.0 }
  0xcf   :  { %90 = vadd.xlane.f32.xlu1 %v89_v11 }
  0xd0   :  { %v88_v12 = vmul.f32 %v86_v10, %v86_v10 }
  0xd2   :  { %v92_v13 = vsel %vm75_vm0, %v88_v12, 0.0 }
  0xd3   :  { %93 = vadd.xlane.f32.xlu1 %v92_v13 }
 0x15c   :  { %v91_v23 = vpop.xlane.xlu1 %90 }
 0x15d   :  { %v95_v24 = vmul.f32 0.015625, %v91_v23 }
 0x15f   :  { %v97_v25 = vadd.f32 1e-12, %v95_v24 }
 0x160   :  { %v94_v26 = vpop.xlane.xlu1 %93 }
 0x161   :  { %4371 = vrsqrt.f32 %v97_v25  ;;  %v96_v28 = vmul.f32 0.015625, %v94_v26 }
 0x163   :  { %v98_v29 = vadd.f32 1e-12, %v96_v28 }
 0x165   :  { %4373 = vrsqrt.f32 %v98_v29 }
 0x16b   :  { %v4372_v33 = vpop.eup %4371 }
 0x16c   :  { %v101_v34 = vmul.f32 %v4372_v33, %v85_v6 }
 0x16e   :  { %v107_v39 = vmul.f32 %v106_v35, %v101_v34 }
 0x16f   :  { %v4374_v37 = vpop.eup %4373 }
 0x170   :  { %v102_v38 = vmul.f32 %v4374_v37, %v86_v10  ;;  %v4697_v42 = vadd.f32 %v112_v40, %v107_v39 }
 0x172   :  { %v108_v41 = vmul.f32 %v106_v35, %v102_v38 }
 0x174   :  { %v4699_v43 = vadd.f32 %v112_v40, %v108_v41 }
 0x176   :  { %v117_v44 = vpack.c.bf16 %v4699_v43, %v4697_v42 }
 0x178   :  { %3796 = vmatmul.mubr.msk.bf16.vlgmr.msra.gmra.mrb[0].mxu0 %vm75_vm0, %v117_v44 }
 0x179   :  { %4051 = vmatprep.mubr.msk.f32.mxu0 %vm4564_vm1, %v4563_v45 }
 0x24b   :  { %v211_v49 = vpop.f32.mrb[0].mxu0 }
 0x24c   :  { %v4714_v50 = vadd.f32 %v211_v49, %v129_v47  ;;  %v213_v51 = vpop.f32.mrb[1].mxu0 }
 0x24d   :  { %v215_v53 = vpop.f32.mrb[2].mxu0  ;;  %v4727_v58 = vadd.f32 %v213_v51, %v133_v52 }
 0x24e   :  { %v4717_v54 = vadd.f32 %v215_v53, %v129_v47  ;;  %v217_v55 = vpop.f32.mrb[3].mxu0  ;;  %222 = vrot.lane.b32.xlu0 %v4714_v50, %s4554_s15  ;;  %v4823_v53 = vld [vmem:[%s5297_s1 + $0x1] sm:$0x1] }
 0x24f   :  { %v4721_v56 = vadd.f32 %v217_v55, %v133_v52 }
 0x252   :  { %390 = vrot.lane.b32.xlu0 %v4714_v50, %s4565_s2 }
 0x2c0   :  { %v223_v57 = vpop.permute.xlu0 %222 }
 0x2c1   :  { %4025 = vmatpush3.xpose.msk.msra.mxu1 %vm224_vm2, %v223_v57 }
 0x2c2   :  { %4029 = vmatprep.subr.mxu1 %v4563_v45 }
 0x2c4   :  { %4027 = vmatmul.mubr.msk.f32.vlgmr.msra.gmra.mrb[0].mxu1 %vm224_vm2, %v4714_v50  ;;  %v391_v10 = vpop.permute.xlu0 %390 }
 0x2c5   :  { %4030 = vmatpush3.msra.mxu1 %v4727_v58  ;;  %4031 = vmatprep.mubr.msk.f32.mxu1 %vm4564_vm1, %v4563_v45 }
 0x2c6   :  { %4034 = vmatprep.subr.mxu1 %v4563_v45 }
 0x397   :  { %v295_v60 = vpop.f32.mrb[0].mxu1 }
 0x398   :  { %v299_v61 = vmul.f32 0.25, %v295_v60  ;;  %v4028_v62 = vpop.f32.mrb[1].mxu1 }
 0x39a   :  { %v304_v63 = vadd.f32 %v4738_v59, %v299_v61  ;;  %v991_v61 = vrot.slane %v4823_v53, %v4687_v31 }
 0x39c   :  { %v306_v0 = vsel %vm305_vm3, %v304_v63, -inf }
 0x39d   :  { %307 = vmax.xlane.f32.xlu1 %v306_v0 }
 0x42a   :  { %v308_v1 = vpop.xlane.xlu1 %307 }
 0x42b   :  { %v309_v2 = vsub.f32 %v304_v63, %v308_v1 }
 0x42d   :  { %v310_v3 = vmul.f32 1.442695, %v309_v2 }
 0x42f   :  { %4375 = vpow2.f32 %v310_v3 }
 0x439   :  { %v4376_v4 = vpop.eup %4375 }
 0x43a   :  { %v312_v5 = vsel %vm305_vm3, %v4376_v4, 0.0 }
 0x43b   :  { %313 = vadd.xlane.f32.xlu1 %v312_v5 }
 0x44c   :  { %392 = vrot.lane.b32.xlu1 %v4714_v50, %s4566_s0 }
 0x4c8   :  { %v314_v6 = vpop.xlane.xlu1 %313 }
 0x4c9   :  { %4377 = vrcp.f32 %v314_v6 }
 0x4cc   :  { %v393_v9 = vpop.permute.xlu1 %392 }
 0x4d3   :  { %v4378_v7 = vpop.eup %4377 }
 0x4d4   :  { %v316_v8 = vmul.f32 %v4378_v7, %v4376_v4 }
 0x4d6   :  { %4032 = vmatmul.mubr.msk.f32.vlgmr.msra.gmra.mrb[2].mxu1 %vm305_vm3, %v316_v8 }
 0x4d7   :  { %4035 = vmatpush3.xpose.msk.msra.mxu1 %vm224_vm2, %v393_v9  ;;  %4036 = vmatprep.mubr.msk.f32.mxu1 %vm4564_vm1, %v4563_v45 }
 0x4d8   :  { %4039 = vmatprep.subr.mxu1 %v4563_v45 }
 0x4da   :  { %4037 = vmatmul.mubr.msk.f32.vlgmr.msra.gmra.mrb[4].mxu1 %vm224_vm2, %v391_v10 }
 0x4db   :  { %4041 = vmatprep.mubr.msk.f32.mxu1 %vm4564_vm1, %v4563_v45 }
 0x5a9   :  { %v4753_v11 = vpop.f32.mrb[2].mxu1 }
 0x5aa   :  { %v4033_v12 = vpop.f32.mrb[3].mxu1 }
 0x5ad   :  { %v464_v13 = vpop.f32.mrb[4].mxu1 }
 0x5ae   :  { %v468_v14 = vmul.f32 0.25, %v464_v13  ;;  %v4038_v15 = vpop.f32.mrb[5].mxu1 }
 0x5b0   :  { %v469_v16 = vadd.f32 %v4738_v59, %v468_v14 }
 0x5b2   :  { %v470_v17 = vsel %vm305_vm3, %v469_v16, -inf }
 0x5b3   :  { %471 = vmax.xlane.f32.xlu1 %v470_v17 }
 0x5c4   :  { %560 = vrot.lane.b32.xlu1 %v4714_v50, %s4567_s22 }
 0x5c8   :  { %558 = vrot.lane.b32.xlu1 %v4714_v50, %s4568_s23 }
 0x5cc   :  { %725 = vrot.lane.b32.xlu1 %v4714_v50, %s4569_s7 }
 0x5d0   :  { %1079 = vrot.lane.b32.xlu1 %v4717_v54, %s4566_s0 }
 0x5d4   :  { %1247 = vrot.lane.b32.xlu1 %v4717_v54, %s4567_s22 }
 0x5d8   :  { %1414 = vrot.lane.b32.xlu1 %v4717_v54, %s4561_s20 }
 0x640   :  { %v472_v18 = vpop.xlane.xlu1 %471 }
 0x641   :  { %v473_v19 = vsub.f32 %v469_v16, %v472_v18 }
 0x643   :  { %v474_v20 = vmul.f32 1.442695, %v473_v19 }
 0x644   :  { %v561_v25 = vpop.permute.xlu1 %560 }
 0x645   :  { %4379 = vpow2.f32 %v474_v20 }
 0x648   :  { %v559_v27 = vpop.permute.xlu1 %558 }
 0x64c   :  { %v726_v33 = vpop.permute.xlu1 %725 }
 0x64f   :  { %v4380_v21 = vpop.eup %4379 }
 0x650   :  { %v476_v23 = vsel %vm305_vm3, %v4380_v21, 0.0  ;;  %v1080_v35 = vpop.permute.xlu1 %1079 }
 0x651   :  { %477 = vadd.xlane.f32.xlu0 %v476_v23 }
 0x654   :  { %v1248_v38 = vpop.permute.xlu1 %1247 }
 0x658   :  { %v1415_v40 = vpop.permute.xlu1 %1414 }
 0x667   :  { %482 = vrot.lane.b32.xlu0 %v4727_v58, %s4565_s2 }
 0x66b   :  { %727 = vrot.lane.b32.xlu0 %v4714_v50, %s4561_s20 }
 0x66f   :  { %911 = vrot.lane.b32.xlu0 %v4717_v54, %s4554_s15 }
 0x673   :  { %1077 = vrot.lane.b32.xlu0 %v4717_v54, %s4565_s2 }
 0x677   :  { %1245 = vrot.lane.b32.xlu0 %v4717_v54, %s4568_s23 }
 0x67b   :  { %1412 = vrot.lane.b32.xlu0 %v4717_v54, %s4569_s7 }
 0x6de   :  { %v478_v24 = vpop.xlane.xlu0 %477 }
 0x6df   :  { %4381 = vrcp.f32 %v478_v24 }
 0x6e2   :  { %v483_v26 = vpop.permute.xlu0 %482 }
 0x6e3   :  { %4040 = vmatpush3.msra.mxu1 %v483_v26 }
 0x6e4   :  { %4044 = vmatprep.subr.mxu1 %v4563_v45 }
 0x6e6   :  { %v728_v32 = vpop.permute.xlu0 %727 }
 0x6e9   :  { %v4382_v28 = vpop.eup %4381 }
 0x6ea   :  { %v480_v29 = vmul.f32 %v4382_v28, %v4380_v21  ;;  %v912_v34 = vpop.permute.xlu0 %911 }
 0x6ec   :  { %4042 = vmatmul.mubr.msk.f32.vlgmr.msra.gmra.mrb[6].mxu1 %vm305_vm3, %v480_v29 }
 0x6ed   :  { %4045 = vmatpush3.xpose.msk.msra.mxu1 %vm224_vm2, %v561_v25  ;;  %4046 = vmatprep.mubr.msk.f32.mxu1 %vm4564_vm1, %v4563_v45 }
 0x6ee   :  { %4054 = vmatprep.subr.mxu1 %v4563_v45  ;;  %v1078_v37 = vpop.permute.xlu0 %1077 }
 0x6f0   :  { %4047 = vmatmul.mubr.msk.f32.vlgmr.msra.gmra.mrb[8].mxu1 %vm224_vm2, %v559_v27 }
 0x6f1   :  { %4055 = vmatpush3.xpose.msk.msra.mxu1 %vm224_vm2, %v728_v32  ;;  %4056 = vmatprep.mubr.msk.f32.mxu1 %vm4564_vm1, %v4563_v45 }
 0x6f2   :  { %4064 = vmatprep.subr.mxu1 %v4563_v45  ;;  %v1246_v39 = vpop.permute.xlu0 %1245 }
 0x6f4   :  { %4057 = vmatmul.mubr.msk.f32.vlgmr.msra.gmra.mrb[10].mxu1 %vm224_vm2, %v726_v33 }
 0x6f5   :  { %4065 = vmatpush3.xpose.msk.msra.mxu1 %vm224_vm2, %v912_v34  ;;  %4066 = vmatprep.mubr.msk.f32.mxu1 %vm4564_vm1, %v4563_v45 }
 0x6f6   :  { %4074 = vmatprep.subr.mxu1 %v4563_v45  ;;  %v1413_v41 = vpop.permute.xlu0 %1412 }
 0x6f8   :  { %4067 = vmatmul.mubr.msk.f32.vlgmr.msra.gmra.mrb[12].mxu1 %vm224_vm2, %v4717_v54 }
 0x6f9   :  { %4075 = vmatpush3.xpose.msk.msra.mxu1 %vm224_vm2, %v1080_v35  ;;  %4076 = vmatprep.mubr.msk.f32.mxu1 %vm4564_vm1, %v4563_v45 }
 0x6fa   :  { %4084 = vmatprep.subr.mxu1 %v4563_v45 }
 0x6fc   :  { %4077 = vmatmul.mubr.msk.f32.vlgmr.msra.gmra.mrb[14].mxu1 %vm224_vm2, %v1078_v37 }
 0x6fd   :  { %4085 = vmatpush3.xpose.msk.msra.mxu1 %vm224_vm2, %v1248_v38  ;;  %4086 = vmatprep.mubr.msk.f32.mxu1 %vm4564_vm1, %v4563_v45 }
 0x6fe   :  { %4094 = vmatprep.subr.mxu1 %v4563_v45 }
 0x700   :  { %4087 = vmatmul.mubr.msk.f32.vlgmr.msra.gmra.mrb[16].mxu1 %vm224_vm2, %v1246_v39 }
 0x701   :  { %4095 = vmatpush3.xpose.msk.msra.mxu1 %vm224_vm2, %v1415_v40  ;;  %4096 = vmatprep.mubr.msk.f32.mxu1 %vm4564_vm1, %v4563_v45 }
 0x702   :  { %4128 = vmatprep.subr.bf16.mxu1 %v4563_v45 }
 0x704   :  { %4097 = vmatmul.mubr.msk.f32.vlgmr.msra.gmra.mrb[18].mxu1 %vm224_vm2, %v1413_v41 }
 0x705   :  { %4144 = vmatprep.mubr.msk.bf16.mxu1 %vm4564_vm1, %v4563_v45 }
 0x7bf   :  { %v4817_v44 = vpop.f32.mrb[6].mxu1 }
 0x7c0   :  { %v4043_v47 = vpop.f32.mrb[7].mxu1 }
 0x7c3   :  { %v632_v48 = vpop.f32.mrb[8].mxu1 }
 0x7c4   :  { %v636_v49 = vmul.f32 0.25, %v632_v48  ;;  %v4048_v50 = vpop.f32.mrb[9].mxu1 }
 0x7c6   :  { %v637_v51 = vadd.f32 %v4738_v59, %v636_v49 }
 0x7c7   :  { %v799_v52 = vpop.f32.mrb[10].mxu1 }
 0x7c8   :  { %v803_v54 = vmul.f32 0.25, %v799_v52  ;;  %v4058_v55 = vpop.f32.mrb[11].mxu1  ;;  %v638_v57 = vsel %vm305_vm3, %v637_v51, -inf }
 0x7c9   :  { %639 = vmax.xlane.f32.xlu1 %v638_v57 }
 0x7ca   :  { %v804_v60 = vadd.f32 %v4738_v59, %v803_v54 }
 0x7cb   :  { %v983_v62 = vpop.f32.mrb[12].mxu1 }
 0x7cc   :  { %v987_v63 = vmul.f32 0.25, %v983_v62  ;;  %v4068_v0 = vpop.f32.mrb[13].mxu1  ;;  %v805_v1 = vsel %vm305_vm3, %v804_v60, -inf }
 0x7cd   :  { %806 = vmax.xlane.f32.xlu0 %v805_v1 }
 0x7ce   :  { %v992_v2 = vadd.f32 %v991_v61, %v987_v63 }
 0x7cf   :  { %v1151_v3 = vpop.f32.mrb[14].mxu1 }
 0x7d0   :  { %v1155_v4 = vmul.f32 0.25, %v1151_v3  ;;  %v4078_v5 = vpop.f32.mrb[15].mxu1  ;;  %v993_v6 = vsel %vm305_vm3, %v992_v2, -inf }
 0x7d1   :  { %994 = vmax.xlane.f32.xlu0 %v993_v6 }
 0x7d2   :  { %v1156_v7 = vadd.f32 %v1155_v4, %v991_v61 }
 0x7d3   :  { %v1319_v8 = vpop.f32.mrb[16].mxu1 }
 0x7d4   :  { %v1323_v9 = vmul.f32 0.25, %v1319_v8  ;;  %v4088_v59 = vpop.f32.mrb[17].mxu1  ;;  %v1157_v10 = vsel %vm305_vm3, %v1156_v7, -inf }
 0x7d5   :  { %1158 = vmax.xlane.f32.xlu0 %v1157_v10 }
 0x7d6   :  { %v1324_v12 = vadd.f32 %v1323_v9, %v991_v61 }
 0x7d7   :  { %v1486_v13 = vpop.f32.mrb[18].mxu1 }
 0x7d8   :  { %v1490_v14 = vmul.f32 0.25, %v1486_v13  ;;  %v4098_v15 = vpop.f32.mrb[19].mxu1  ;;  %v1325_v16 = vsel %vm305_vm3, %v1324_v12, -inf }
 0x7d9   :  { %1326 = vmax.xlane.f32.xlu1 %v1325_v16 }
 0x7da   :  { %v1491_v17 = vadd.f32 %v1490_v14, %v991_v61 }
 0x7dc   :  { %v1492_v18 = vsel %vm305_vm3, %v1491_v17, -inf }
 0x7dd   :  { %1493 = vmax.xlane.f32.xlu0 %v1492_v18 }
 0x7ea   :  { %649 = vrot.lane.b32.xlu1 %v4727_v58, %s4568_s23 }
 0x856   :  { %v640_v19 = vpop.xlane.xlu1 %639 }
 0x857   :  { %v641_v20 = vsub.f32 %v637_v51, %v640_v19  ;;  %v4327_v19 = vld [vmem:[%s5300_s4] sm:$0xff]  }
 0x859   :  { %v642_v21 = vmul.f32 1.442695, %v641_v20 }
 0x85a   :  { %v807_v23 = vpop.xlane.xlu0 %806 }
 0x85b   :  { %4383 = vpow2.f32 %v642_v21  ;;  %v808_v24 = vsub.f32 %v804_v60, %v807_v23  ;;  %v4328_v23 = vld [vmem:[%s5300_s4 + $0x8] sm:$0xff]  }
 0x85d   :  { %v809_v25 = vmul.f32 1.442695, %v808_v24 }
 0x85e   :  { %v995_v26 = vpop.xlane.xlu0 %994 }
 0x85f   :  { %4385 = vpow2.f32 %v809_v25  ;;  %v996_v27 = vsub.f32 %v992_v2, %v995_v26  ;;  %v4329_v26 = vld [vmem:[%s5300_s4 + $0x10] sm:$0xff]  }
 0x861   :  { %v997_v28 = vmul.f32 1.442695, %v996_v27 }
 0x862   :  { %v1159_v29 = vpop.xlane.xlu0 %1158 }
 0x863   :  { %4387 = vpow2.f32 %v997_v28  ;;  %v1160_v32 = vsub.f32 %v1156_v7, %v1159_v29  ;;  %v4330_v29 = vld [vmem:[%s5300_s4 + $0x18] sm:$0xff]  }
 0x865   :  { %v4384_v33 = vpop.eup %4383  ;;  %v1161_v34 = vmul.f32 1.442695, %v1160_v32 }
 0x866   :  { %v1327_v35 = vpop.xlane.xlu1 %1326  ;;  %v644_v37 = vsel %vm305_vm3, %v4384_v33, 0.0 }
 0x867   :  { %4389 = vpow2.f32 %v1161_v34  ;;  %v1328_v38 = vsub.f32 %v1324_v12, %v1327_v35  ;;  %645 = vadd.xlane.f32.xlu1 %v644_v37 }
 0x869   :  { %v4386_v39 = vpop.eup %4385  ;;  %v1329_v40 = vmul.f32 1.442695, %v1328_v38 }
 0x86a   :  { %v650_v41 = vpop.permute.xlu1 %649  ;;  %v1494_v47 = vpop.xlane.xlu0 %1493  ;;  %v811_v48 = vsel %vm305_vm3, %v4386_v39, 0.0 }
 0x86b   :  { %4391 = vpow2.f32 %v1329_v40  ;;  %v1495_v49 = vsub.f32 %v1491_v17, %v1494_v47  ;;  %4050 = vmatpush3.msra.mxu0 %v650_v41  ;;  %812 = vadd.xlane.f32.xlu0 %v811_v48 }
 0x86c   :  { %4059 = vmatprep.subr.mxu0 %v4563_v45 }
 0x86d   :  { %v4388_v50 = vpop.eup %4387  ;;  %v1496_v51 = vmul.f32 1.442695, %v1495_v49 }
 0x86e   :  { %v999_v52 = vsel %vm305_vm3, %v4388_v50, 0.0 }
 0x86f   :  { %4393 = vpow2.f32 %v1496_v51  ;;  %1000 = vadd.xlane.f32.xlu1 %v999_v52 }
 0x871   :  { %v4390_v54 = vpop.eup %4389 }
 0x872   :  { %v1163_v55 = vsel %vm305_vm3, %v4390_v54, 0.0 }
 0x873   :  { %1164 = vadd.xlane.f32.xlu0 %v1163_v55 }
 0x875   :  { %v4392_v57 = vpop.eup %4391 }
 0x876   :  { %v1331_v60 = vsel %vm305_vm3, %v4392_v57, 0.0 }
 0x877   :  { %1332 = vadd.xlane.f32.xlu1 %v1331_v60 }
 0x879   :  { %v4394_v61 = vpop.eup %4393 }
 0x87a   :  { %v1498_v62 = vsel %vm305_vm3, %v4394_v61, 0.0 }
 0x87b   :  { %1499 = vadd.xlane.f32.xlu0 %v1498_v62 }
 0x888   :  { %1169 = vrot.lane.b32.xlu1 %v4721_v56, %s4565_s2 }
 0x88c   :  { %1336 = vrot.lane.b32.xlu1 %v4721_v56, %s4568_s23 }
 0x890   :  { %1503 = vrot.lane.b32.xlu1 %v4721_v56, %s4569_s7 }
 0x891   :  { %816 = vrot.lane.b32.xlu0 %v4727_v58, %s4569_s7 }
 0x8f4   :  { %v646_v63 = vpop.xlane.xlu1 %645 }
 0x8f5   :  { %4395 = vrcp.f32 %v646_v63 }
 0x8f8   :  { %v813_v0 = vpop.xlane.xlu0 %812 }
 0x8f9   :  { %4397 = vrcp.f32 %v813_v0 }
 0x8fc   :  { %v1001_v3 = vpop.xlane.xlu1 %1000 }
 0x8fd   :  { %4399 = vrcp.f32 %v1001_v3 }
 0x8ff   :  { %v4396_v1 = vpop.eup %4395 }
 0x900   :  { %v648_v2 = vmul.f32 %v4396_v1, %v4384_v33  ;;  %v1165_v4 = vpop.xlane.xlu0 %1164 }
 0x901   :  { %4401 = vrcp.f32 %v1165_v4 }
 0x902   :  { %4052 = vmatmul.mubr.msk.f32.vlgmr.msra.gmra.mrb[4].mxu0 %vm305_vm3, %v648_v2  ;;  %v1606_v2 = vrot.slane %v4710_v46, %v4694_v36 }
 0x903   :  { %4061 = vmatprep.mubr.msk.f32.mxu0 %vm4564_vm1, %v4563_v45  ;;  %v4398_v7 = vpop.eup %4397 }
 0x904   :  { %v1333_v5 = vpop.xlane.xlu1 %1332  ;;  %v815_v58 = vmul.f32 %v4398_v7, %v4386_v39 }
 0x905   :  { %4403 = vrcp.f32 %v1333_v5 }
 0x907   :  { %v4400_v9 = vpop.eup %4399 }
 0x908   :  { %v1500_v6 = vpop.xlane.xlu0 %1499  ;;  %v1170_v59 = vpop.permute.xlu1 %1169  ;;  %v1003_v10 = vmul.f32 %v4400_v9, %v4388_v50 }
 0x909   :  { %4405 = vrcp.f32 %v1500_v6 }
 0x90b   :  { %v4402_v12 = vpop.eup %4401 }
 0x90c   :  { %v817_v8 = vpop.permute.xlu0 %816  ;;  %v1167_v13 = vmul.f32 %v4402_v12, %v4390_v54  ;;  %v1337_v14 = vpop.permute.xlu1 %1336 }
 0x90d   :  { %4060 = vmatpush3.msra.mxu0 %v817_v8 }
 0x90e   :  { %4062 = vmatmul.mubr.msk.f32.vlgmr.msra.gmra.mrb[6].mxu0 %vm305_vm3, %v815_v58  ;;  %4069 = vmatprep.subr.mxu0 %v4563_v45 }
 0x90f   :  { %4070 = vmatpush3.msra.mxu0 %v4721_v56  ;;  %4071 = vmatprep.mubr.msk.f32.mxu0 %vm4564_vm1, %v4563_v45  ;;  %v4404_v15 = vpop.eup %4403 }
 0x910   :  { %4079 = vmatprep.subr.mxu0 %v4563_v45  ;;  %v1335_v56 = vmul.f32 %v4404_v15, %v4392_v57  ;;  %v1504_v17 = vpop.permute.xlu1 %1503 }
 0x912   :  { %4072 = vmatmul.mubr.msk.f32.vlgmr.msra.gmra.mrb[8].mxu0 %vm305_vm3, %v1003_v10 }
 0x913   :  { %4080 = vmatpush3.msra.mxu0 %v1170_v59  ;;  %4081 = vmatprep.mubr.msk.f32.mxu0 %vm4564_vm1, %v4563_v45  ;;  %v4406_v16 = vpop.eup %4405 }
 0x914   :  { %4089 = vmatprep.subr.mxu0 %v4563_v45  ;;  %v1502_v18 = vmul.f32 %v4406_v16, %v4394_v61 }
 0x916   :  { %4082 = vmatmul.mubr.msk.f32.vlgmr.msra.gmra.mrb[10].mxu0 %vm305_vm3, %v1167_v13 }
 0x917   :  { %4090 = vmatpush3.msra.mxu0 %v1337_v14  ;;  %4091 = vmatprep.mubr.msk.f32.mxu0 %vm4564_vm1, %v4563_v45 }
 0x918   :  { %4099 = vmatprep.subr.mxu0 %v4563_v45 }
 0x91a   :  { %4092 = vmatmul.mubr.msk.f32.vlgmr.msra.gmra.mrb[12].mxu0 %vm305_vm3, %v1335_v56 }
 0x91b   :  { %4100 = vmatpush3.msra.mxu0 %v1504_v17  ;;  %4101 = vmatprep.mubr.msk.f32.mxu0 %vm4564_vm1, %v4563_v45 }
 0x91c   :  { %4104 = vmatprep.subr.bf16.mxu0 %v4563_v45 }
 0x91e   :  { %4102 = vmatmul.mubr.msk.f32.vlgmr.msra.gmra.mrb[14].mxu0 %vm305_vm3, %v1502_v18 }
 0x91f   :  { %4112 = vmatprep.mubr.msk.bf16.mxu0 %vm4564_vm1, %v4563_v45  ;;  %4105 = vmatpush3.bf16.msra.mxu0 %v4327_v19  ;;  %v4331_v19 = vld [vmem:[#allocation5] sm:$0xff]  }
 0x920   :  { %4106 = vmatprep.subr.bf16.mxu0 %v4563_v45 }
 0x923   :  { %4107 = vmatpush3.bf16.msra.mxu0 %v4328_v23 }
 0x924   :  { %4108 = vmatprep.subr.bf16.mxu0 %v4563_v45 }
 0x927   :  { %4109 = vmatpush3.bf16.msra.mxu0 %v4329_v26 }
 0x928   :  { %4110 = vmatprep.subr.bf16.mxu0 %v4563_v45 }
 0x92b   :  { %4111 = vmatpush3.bf16.msra.mxu0 %v4330_v29  ;;  %v1705_v29 = vsub.s32 2, %v4684_v30 }
 0x92c   :  { %4116 = vmatprep.subr.bf16.mxu0 %v4563_v45 }
 0x9d5   :  { %v721_v20 = vpop.f32.mrb[4].mxu0 }
 0x9d6   :  { %v4053_v21 = vpop.f32.mrb[5].mxu0 }
 0x9d7   :  { %v4334_v21 = vld [vmem:[#allocation5 + $0x18] sm:$0xff]  }
 0x9e1   :  { %v888_v24 = vpop.f32.mrb[6].mxu0 }
 0x9e2   :  { %v4063_v25 = vpop.f32.mrb[7].mxu0 }
 0x9e5   :  { %v1073_v27 = vpop.f32.mrb[8].mxu0 }
 0x9e6   :  { %v4073_v28 = vpop.f32.mrb[9].mxu0 }
 0x9e9   :  { %v1241_v32 = vpop.f32.mrb[10].mxu0 }
 0x9ea   :  { %v4290_v33 = vpack.i.bf16 %v1241_v32, %v4817_v44  ;;  %v4083_v34 = vpop.f32.mrb[11].mxu0 }
 0x9ec   :  { %4291 = vrot.lane.b32.xlu0 %v4290_v33, %s4561_s20  ;;  %v1706_v33 = vrot.slane %v4710_v46, %v1705_v29 }
 0x9ed   :  { %v1408_v35 = vpop.f32.mrb[12].mxu0 }
 0x9ee   :  { %v4295_v37 = vpack.i.bf16 %v1408_v35, %v721_v20  ;;  %v4093_v38 = vpop.f32.mrb[13].mxu0  ;;  %v4333_v20 = vld [vmem:[#allocation5 + $0x10] sm:$0xff]   ;;  %v1711_v35 = vsub.s32 3, %v4684_v30 }
 0x9f0   :  { %4296 = vrot.lane.b32.xlu1 %v4295_v37, %s4567_s22 }
 0x9f1   :  { %v1575_v39 = vpop.f32.mrb[14].mxu0 }
 0x9f2   :  { %v4300_v40 = vpack.i.bf16 %v1575_v39, %v888_v24  ;;  %v4103_v41 = vpop.f32.mrb[15].mxu0 }
 0x9f4   :  { %4301 = vrot.lane.b32.xlu0 %v4300_v40, %s4566_s0  ;;  %v1712_v40 = vrot.slane %v4710_v46, %v1711_v35 }
 0xa5e   :  { %v4292_v47 = vpop.permute.xlu0 %4291 }
 0xa5f   :  { %v4294_v49 = vunpack.i.h.bf16 %v4292_v47  ;;  %v4293_v44 = vunpack.i.l.bf16 %v4292_v47 }
 0xa61   :  { %v1591_v54 = vsel %vm224_vm2, %v1073_v27, %v4294_v49  ;;  %v904_v55 = vsel %vm224_vm2, %v4753_v11, %v4293_v44  ;;  %v4335_v44 = vld [vmem:[%s5302_s6] sm:$0xff]  }
 0xa62   :  { %v4297_v48 = vpop.permute.xlu1 %4296  ;;  %4129 = vmatpush3.bf16.msra.mxu1 %v4335_v44 }
 0xa63   :  { %v4299_v50 = vunpack.i.h.bf16 %v4297_v48  ;;  %v4298_v51 = vunpack.i.l.bf16 %v4297_v48  ;;  %4130 = vmatprep.subr.bf16.mxu1 %v4563_v45 }
 0xa65   :  { %v1592_v61 = vsel %vm905_vm4, %v1591_v54, %v4299_v50  ;;  %v906_v62 = vsel %vm905_vm4, %v904_v55, %v4298_v51  ;;  %v4336_v50 = vld [vmem:[%s5302_s6 + $0x8] sm:$0xff]   ;;  %v4337_v51 = vld [vmem:[%s5302_s6 + $0x10] sm:$0xff]  }
 0xa66   :  { %v4302_v52 = vpop.permute.xlu0 %4301  ;;  %4131 = vmatpush3.bf16.msra.mxu1 %v4336_v50  ;;  %v4340_v54 = vld [vmem:[%s5302_s6 + $0x28] sm:$0xff]   ;;  %v4341_v55 = vld [vmem:[%s5302_s6 + $0x30] sm:$0xff]  }
 0xa67   :  { %v4304_v57 = vunpack.i.h.bf16 %v4302_v52  ;;  %v4303_v60 = vunpack.i.l.bf16 %v4302_v52  ;;  %4132 = vmatprep.subr.bf16.mxu1 %v4563_v45  ;;  %v4339_v52 = vld [vmem:[%s5302_s6 + $0x20] sm:$0xff]  }
 0xa69   :  { %v1593_v63 = vsel %vm907_vm5, %v1592_v61, %v4304_v57  ;;  %v908_v0 = vsel %vm907_vm5, %v906_v62, %v4303_v60  ;;  %v4342_v57 = vld [vmem:[%s5302_s6 + $0x38] sm:$0xff]   ;;  %v1726_v60 = vsub.s32 4, %v4684_v30 }
 0xa6a   :  { %v1594_v1 = vpack.c.bf16 %v1593_v63, %v908_v0  ;;  %4133 = vmatpush3.bf16.msra.mxu1 %v4337_v51  ;;  %v4343_v51 = vld [vmem:[%s5299_s3 + $0x40] ss:$8 sps:$4 sm:$0xff]  }
 0xa6b   :  { %4134 = vmatprep.subr.bf16.mxu1 %v4563_v45  ;;  %v1727_v61 = vrot.slane %v4710_v46, %v1726_v60 }
 0xa6c   :  { %4113 = vmatmul.mubr.msk.bf16.vlgmr.msra.gmra.mrb[16].mxu0 %vm75_vm0, %v1594_v1 }
 0xa6d   :  { %4124 = vmatprep.mubr.msk.bf16.mxu0 %vm4564_vm1, %v4563_v45  ;;  %4117 = vmatpush3.bf16.msra.mxu0 %v4331_v19  ;;  %v1833_v19 = vsub.s32 5, %v4684_v30 }
 0xa6e   :  { %4118 = vmatprep.subr.bf16.mxu0 %v4563_v45 }
 0xb3f   :  { %v1668_v11 = vpop.f32.mrb[16].mxu0 }
 0xb40   :  { %v1669_v3 = vadd.f32 %v1668_v11, %v1606_v2  ;;  %v4114_v4 = vpop.f32.mrb[17].mxu0 }
 0xb41   :  { %v1671_v5 = vpop.f32.mrb[18].mxu0 }
 0xb42   :  { %v1672_v6 = vadd.f32 %v1671_v5, %v1606_v2  ;;  %v4115_v7 = vpop.f32.mrb[19].mxu0  ;;  %v1675_v58 = vadd.f32 %v1669_v3, %v4697_v42 }
 0xb44   :  { %v1677_v8 = vsel %vm75_vm0, %v1675_v58, 0.0  ;;  %v1676_v9 = vadd.f32 %v1672_v6, %v4699_v43  ;;  %v4332_v43 = vld [vmem:[#allocation5 + $0x8] sm:$0xff]  }
 0xb45   :  { %1678 = vadd.xlane.f32.xlu1 %v1677_v8  ;;  %4119 = vmatpush3.bf16.msra.mxu0 %v4332_v43  ;;  %v1834_v43 = vrot.slane %v4710_v46, %v1833_v19 }
 0xb46   :  { %v1680_v59 = vsel %vm75_vm0, %v1676_v9, 0.0  ;;  %4120 = vmatprep.subr.bf16.mxu0 %v4563_v45 }
 0xb47   :  { %1681 = vadd.xlane.f32.xlu0 %v1680_v59 }
 0xb49   :  { %4121 = vmatpush3.bf16.msra.mxu0 %v4333_v20 }
 0xb4a   :  { %4122 = vmatprep.subr.bf16.mxu0 %v4563_v45 }
 0xb4d   :  { %4123 = vmatpush3.bf16.msra.mxu0 %v4334_v21 }
 0xbd2   :  { %v1679_v10 = vpop.xlane.xlu1 %1678 }
 0xbd3   :  { %v1683_v12 = vmul.f32 0.015625, %v1679_v10 }
 0xbd4   :  { %v1682_v13 = vpop.xlane.xlu0 %1681 }
 0xbd5   :  { %v1685_v14 = vsub.f32 %v1675_v58, %v1683_v12  ;;  %v1684_v15 = vmul.f32 0.015625, %v1682_v13 }
 0xbd7   :  { %v1686_v56 = vsub.f32 %v1676_v9, %v1684_v15  ;;  %v1687_v16 = vmul.f32 %v1685_v14, %v1685_v14 }
 0xbd9   :  { %v1689_v17 = vsel %vm75_vm0, %v1687_v16, 0.0  ;;  %v1688_v18 = vmul.f32 %v1686_v56, %v1686_v56 }
 0xbda   :  { %1690 = vadd.xlane.f32.xlu0 %v1689_v17 }
 0xbdb   :  { %v1692_v42 = vsel %vm75_vm0, %v1688_v18, 0.0 }
 0xbde   :  { %1693 = vadd.xlane.f32.xlu0 %v1692_v42 }
 0xc67   :  { %v1691_v23 = vpop.xlane.xlu0 %1690 }
 0xc68   :  { %v1695_v24 = vmul.f32 0.015625, %v1691_v23 }
 0xc6a   :  { %v1697_v25 = vadd.f32 1e-12, %v1695_v24 }
 0xc6b   :  { %v1694_v26 = vpop.xlane.xlu0 %1693 }
 0xc6c   :  { %4407 = vrsqrt.f32 %v1697_v25  ;;  %v1696_v27 = vmul.f32 0.015625, %v1694_v26 }
 0xc6e   :  { %v1698_v28 = vadd.f32 1e-12, %v1696_v27 }
 0xc70   :  { %4409 = vrsqrt.f32 %v1698_v28 }
 0xc76   :  { %v4408_v32 = vpop.eup %4407 }
 0xc77   :  { %v1701_v34 = vmul.f32 %v4408_v32, %v1685_v14 }
 0xc79   :  { %v1707_v38 = vmul.f32 %v1706_v33, %v1701_v34 }
 0xc7a   :  { %v4410_v37 = vpop.eup %4409 }
 0xc7b   :  { %v1702_v39 = vmul.f32 %v4410_v37, %v1686_v56  ;;  %v4924_v47 = vadd.f32 %v1712_v40, %v1707_v38 }
 0xc7d   :  { %v1708_v41 = vmul.f32 %v1706_v33, %v1702_v39 }
 0xc7f   :  { %v4926_v48 = vadd.f32 %v1712_v40, %v1708_v41 }
 0xc81   :  { %v1715_v49 = vpack.c.bf16 %v4926_v48, %v4924_v47 }
 0xc83   :  { %4125 = vmatmul.mubr.msk.bf16.vlgmr.msra.gmra.mrb[20].mxu0 %vm75_vm0, %v1715_v49 }
 0xc84   :  { %2060 = vmatprep.mubr.bf16.mxu0 %v4562_v22  ;;  %v4338_v22 = vld [vmem:[%s5302_s6 + $0x18] sm:$0xff]  }
 0xc85   :  { %4135 = vmatpush3.bf16.msra.mxu1 %v4338_v22  ;;  %v4348_v22 = vld [vmem:[%s5299_s3 + $0x54] ss:$8 sps:$4 sm:$0xff]  }
 0xc86   :  { %4136 = vmatprep.subr.bf16.mxu1 %v4563_v45 }
 0xc89   :  { %4137 = vmatpush3.bf16.msra.mxu1 %v4339_v52  ;;  %v4346_v52 = vld [vmem:[%s5299_s3 + $0x50] ss:$8 sps:$4 sm:$0xff]  }
 0xc8a   :  { %4138 = vmatprep.subr.bf16.mxu1 %v4563_v45 }
 0xc8d   :  { %4139 = vmatpush3.bf16.msra.mxu1 %v4340_v54  ;;  %v4351_v54 = vld [vmem:[%s5299_s3 + $0x64] ss:$8 sps:$4 sm:$0xff]  }
 0xc8e   :  { %4140 = vmatprep.subr.bf16.mxu1 %v4563_v45 }
 0xc91   :  { %4141 = vmatpush3.bf16.msra.mxu1 %v4341_v55  ;;  %v4349_v55 = vld [vmem:[%s5299_s3 + $0x60] ss:$8 sps:$4 sm:$0xff]  }
 0xc92   :  { %4142 = vmatprep.subr.bf16.mxu1 %v4563_v45 }
 0xc95   :  { %4143 = vmatpush3.bf16.msra.mxu1 %v4342_v57  ;;  %v4352_v57 = vld [vmem:[%s5299_s3 + $0x70] ss:$8 sps:$4 sm:$0xff]  }
 0xc96   :  { %4168 = vmatprep.subr.mxu1 %v4563_v45 }
 0xd56   :  { %v1789_v62 = vpop.f32.mrb[20].mxu0 }
 0xd57   :  { %v1790_v63 = vadd.f32 %v1789_v62, %v1727_v61  ;;  %v4126_v0 = vpop.f32.mrb[21].mxu0 }
 0xd58   :  { %v1792_v1 = vpop.f32.mrb[22].mxu0 }
 0xd59   :  { %v1798_v2 = vmul.f32 0.044715, %v1790_v63  ;;  %v1793_v11 = vadd.f32 %v1792_v1, %v1727_v61  ;;  %v4127_v3 = vpop.f32.mrb[23].mxu0  ;;  %v1796_v15 = vmul.f32 0.5, %v1790_v63  ;;  %v4354_v61 = vld [vmem:[%s5299_s3 + $0x74] ss:$8 sps:$4 sm:$0xff]  }
 0xd5a   :  { %v1954_v3 = vsub.s32 6, %v4684_v30 }
 0xd5b   :  { %v1800_v4 = vmul.f32 %v1798_v2, %v1790_v63  ;;  %v1799_v5 = vmul.f32 0.044715, %v1793_v11  ;;  %v1797_v56 = vmul.f32 0.5, %v1793_v11 }
 0xd5d   :  { %v1802_v6 = vmul.f32 %v1800_v4, %v1790_v63  ;;  %v1801_v7 = vmul.f32 %v1799_v5, %v1793_v11  ;;  %v1955_v4 = vrot.slane %v4710_v46, %v1954_v3  ;;  %v1960_v5 = vsub.s32 7, %v4684_v30 }
 0xd5f   :  { %v1804_v58 = vadd.f32 %v1802_v6, %v1790_v63  ;;  %v1803_v8 = vmul.f32 %v1801_v7, %v1793_v11 }
 0xd61   :  { %v1806_v9 = vmul.f32 0.7978846, %v1804_v58  ;;  %v1805_v59 = vadd.f32 %v1803_v8, %v1793_v11 }
 0xd63   :  { %4411 = vtanh.f32 %v1806_v9  ;;  %v1807_v10 = vmul.f32 0.7978846, %v1805_v59  ;;  %v1961_v59 = vrot.slane %v4710_v46, %v1960_v5  ;;  %v1966_v46 = vld [vmem:[#allocation7 + $0x18] sm:$0xff] }
 0xd65   :  { %4413 = vtanh.f32 %v1807_v10 }
 0xd6d   :  { %v4412_v12 = vpop.eup %4411 }
 0xd6e   :  { %v1810_v13 = vadd.f32 1.0, %v4412_v12 }
 0xd6f   :  { %v4414_v14 = vpop.eup %4413 }
 0xd70   :  { %v1811_v16 = vadd.f32 1.0, %v4414_v14  ;;  %v1812_v17 = vmul.f32 %v1810_v13, %v1796_v15 }
 0xd72   :  { %v1813_v18 = vmul.f32 %v1811_v16, %v1797_v56  ;;  %v5019_v16 = vld [vmem:[#allocation7 + $0x10] sm:$0xff] }
 0xd74   :  { %v1814_v42 = vpack.c.bf16 %v1813_v18, %v1812_v17  ;;  %v1980_v17 = vrot.slane %v5019_v16, %v4687_v31 }
 0xd76   :  { %4145 = vmatmul.mubr.bf16.vlgmr.msra.gmra.mrb[20].mxu1 %v1814_v42 }
 0xd77   :  { %4170 = vmatprep.mubr.msk.f32.mxu1 %vm4564_vm1, %v4563_v45 }
 0xe49   :  { %v1917_v20 = vpop.f32.mrb[20].mxu1 }
 0xe4a   :  { %v1918_v21 = vadd.f32 %v1917_v20, %v1834_v43  ;;  %v4146_v23 = vpop.f32.mrb[21].mxu1  ;;  %v1984_v20 = vrot.slane %v1966_v46, %v4687_v31 }
 0xe4b   :  { %v1920_v24 = vpop.f32.mrb[22].mxu1 }
 0xe4c   :  { %v1921_v25 = vadd.f32 %v1920_v24, %v1834_v43  ;;  %v4147_v26 = vpop.f32.mrb[23].mxu1  ;;  %v1924_v27 = vadd.f32 %v1918_v21, %v4924_v47 }
 0xe4e   :  { %v1926_v28 = vsel %vm75_vm0, %v1924_v27, 0.0  ;;  %v1925_v32 = vadd.f32 %v1921_v25, %v4926_v48  ;;  %v4345_v48 = vld [vmem:[%s5299_s3 + $0x44] ss:$8 sps:$4 sm:$0xff]  }
 0xe4f   :  { %1927 = vadd.xlane.f32.xlu1 %v1926_v28  ;;  %2028 = vmatprep.subr.bf16.mxu0 %v4345_v48 }
 0xe50   :  { %v1929_v33 = vsel %vm75_vm0, %v1925_v32, 0.0  ;;  %2029 = vmatpush1.bf16.msra.mxu0 %v4343_v51 }
 0xe51   :  { %1930 = vadd.xlane.f32.xlu0 %v1929_v33  ;;  %2030 = vmatprep.subr.bf16.mxu0 %v4348_v22 }
 0xe54   :  { %2031 = vmatpush1.bf16.msra.mxu0 %v4346_v52 }
 0xe55   :  { %2032 = vmatprep.subr.bf16.mxu0 %v4351_v54 }
 0xe58   :  { %2033 = vmatpush1.bf16.msra.mxu0 %v4349_v55 }
 0xe59   :  { %2034 = vmatprep.subr.bf16.mxu0 %v4354_v61 }
 0xe5c   :  { %2035 = vmatpush1.bf16.msra.mxu0 %v4352_v57 }
 0xe5d   :  { %4148 = vmatprep.subr.mxu0 %v4563_v45 }
 0xedc   :  { %v1928_v34 = vpop.xlane.xlu1 %1927 }
 0xedd   :  { %v1932_v37 = vmul.f32 0.015625, %v1928_v34 }
 0xede   :  { %v1931_v38 = vpop.xlane.xlu0 %1930 }
 0xedf   :  { %v1934_v39 = vsub.f32 %v1924_v27, %v1932_v37  ;;  %v1933_v40 = vmul.f32 0.015625, %v1931_v38 }
 0xee1   :  { %v1935_v41 = vsub.f32 %v1925_v32, %v1933_v40  ;;  %v1936_v49 = vmul.f32 %v1934_v39, %v1934_v39  ;;  %v5064_v40 = vld [vmem:[%s5297_s1] sm:$0x1] }
 0xee3   :  { %v1938_v44 = vsel %vm75_vm0, %v1936_v49, 0.0  ;;  %v1937_v50 = vmul.f32 %v1935_v41, %v1935_v41 }
 0xee4   :  { %1939 = vadd.xlane.f32.xlu1 %v1938_v44 }
 0xee5   :  { %v1941_v47 = vsel %vm75_vm0, %v1937_v50, 0.0 }
 0xee6   :  { %1942 = vadd.xlane.f32.xlu0 %v1941_v47 }
 0xf71   :  { %v1940_v62 = vpop.xlane.xlu1 %1939 }
 0xf72   :  { %v1944_v63 = vmul.f32 0.015625, %v1940_v62 }
 0xf73   :  { %v1943_v0 = vpop.xlane.xlu0 %1942 }
 0xf74   :  { %v1946_v1 = vadd.f32 1e-12, %v1944_v63  ;;  %v1945_v2 = vmul.f32 0.015625, %v1943_v0 }
 0xf76   :  { %4415 = vrsqrt.f32 %v1946_v1  ;;  %v1947_v11 = vadd.f32 1e-12, %v1945_v2 }
 0xf78   :  { %4417 = vrsqrt.f32 %v1947_v11 }
 0xf80   :  { %v4416_v6 = vpop.eup %4415 }
 0xf81   :  { %v1950_v7 = vmul.f32 %v4416_v6, %v1934_v39 }
 0xf82   :  { %v4418_v58 = vpop.eup %4417 }
 0xf83   :  { %v1956_v8 = vmul.f32 %v1955_v4, %v1950_v7  ;;  %v1951_v9 = vmul.f32 %v4418_v58, %v1935_v41 }
 0xf85   :  { %v1957_v10 = vmul.f32 %v1955_v4, %v1951_v9  ;;  %v1962_v12 = vadd.f32 %v1961_v59, %v1956_v8 }
 0xf87   :  { %v1963_v13 = vadd.f32 %v1961_v59, %v1957_v10 }
 0xf89   :  { %v1967_v14 = vpack.c.bf16 %v1963_v13, %v1962_v12  ;;  %v3438_v15 = vrot.slane %v1963_v13, 7 }
 0xf8b   :  { %3855 = vmatmul.mubr.msk.bf16.vlgmr.msra.gmra.mrb[24].mxu0 %vm75_vm0, %v1967_v14  ;;  %v5015_v56 = vsel %vm3435_vm6, %v1962_v12, %v3438_v15 }
 0xf8c   :  { %4150 = vmatprep.mubr.msk.f32.mxu0 %vm4564_vm1, %v4563_v45 }
0x105e   :  { %v2062_v18 = vpop.f32.mrb[24].mxu0 }
0x105f   :  { %v2063_v42 = vadd.f32 %v2062_v18, %v1980_v17  ;;  %v2064_v43 = vpop.f32.mrb[25].mxu0 }
0x1060   :  { %v2066_v21 = vpop.f32.mrb[26].mxu0  ;;  %v5042_v26 = vadd.f32 %v2064_v43, %v1984_v20 }
0x1061   :  { %v2068_v23 = vpop.f32.mrb[27].mxu0  ;;  %2072 = vrot.lane.b32.xlu1 %v2063_v42, %s4554_s15  ;;  %v5032_v25 = vadd.f32 %v2066_v21, %v1980_v17 }
0x1062   :  { %v5025_v24 = vadd.f32 %v2068_v23, %v1984_v20 }
0x1065   :  { %2235 = vrot.lane.b32.xlu1 %v2063_v42, %s4565_s2 }
0x1069   :  { %2405 = vrot.lane.b32.xlu1 %v2063_v42, %s4567_s22 }
0x106d   :  { %2403 = vrot.lane.b32.xlu1 %v2063_v42, %s4568_s23 }
0x1071   :  { %2572 = vrot.lane.b32.xlu1 %v2063_v42, %s4561_s20 }
0x1075   :  { %2570 = vrot.lane.b32.xlu1 %v2063_v42, %s4569_s7 }
0x1079   :  { %2917 = vrot.lane.b32.xlu1 %v5032_v25, %s4566_s0 }
0x107d   :  { %3085 = vrot.lane.b32.xlu1 %v5032_v25, %s4567_s22 }
0x1081   :  { %3252 = vrot.lane.b32.xlu1 %v5032_v25, %s4561_s20 }
0x10d3   :  { %v2073_v31 = vpop.permute.xlu1 %2072 }
0x10d4   :  { %4149 = vmatpush3.xpose.msk.msra.mxu0 %vm224_vm2, %v2073_v31 }
0x10d5   :  { %4153 = vmatprep.subr.mxu0 %v4563_v45 }
0x10d7   :  { %4151 = vmatmul.mubr.msk.f32.vlgmr.msra.gmra.mrb[28].mxu0 %vm224_vm2, %v2063_v42  ;;  %v5045_v27 = vpop.permute.xlu1 %2235 }
0x10d8   :  { %4154 = vmatpush3.msra.mxu0 %v5042_v26  ;;  %4155 = vmatprep.mubr.msk.f32.mxu0 %vm4564_vm1, %v4563_v45 }
0x10d9   :  { %4158 = vmatprep.subr.mxu0 %v4563_v45 }
0x10db   :  { %v2406_v28 = vpop.permute.xlu1 %2405 }
0x10dc   :  { %4169 = vmatpush3.xpose.msk.msra.mxu1 %vm224_vm2, %v2406_v28 }
0x10dd   :  { %4178 = vmatprep.subr.mxu1 %v4563_v45 }
0x10df   :  { %v2404_v32 = vpop.permute.xlu1 %2403 }
0x10e0   :  { %4171 = vmatmul.mubr.msk.f32.vlgmr.msra.gmra.mrb[24].mxu1 %vm224_vm2, %v2404_v32 }
0x10e1   :  { %4180 = vmatprep.mubr.msk.f32.mxu1 %vm4564_vm1, %v4563_v45 }
0x10e3   :  { %v2573_v33 = vpop.permute.xlu1 %2572 }
0x10e4   :  { %4179 = vmatpush3.xpose.msk.msra.mxu1 %vm224_vm2, %v2573_v33 }
0x10e5   :  { %4188 = vmatprep.subr.mxu1 %v4563_v45 }
0x10e7   :  { %v2571_v34 = vpop.permute.xlu1 %2570 }
0x10e8   :  { %4181 = vmatmul.mubr.msk.f32.vlgmr.msra.gmra.mrb[26].mxu1 %vm224_vm2, %v2571_v34 }
0x10e9   :  { %4190 = vmatprep.mubr.msk.f32.mxu1 %vm4564_vm1, %v4563_v45 }
0x10eb   :  { %v2918_v4 = vpop.permute.xlu1 %2917 }
0x10ef   :  { %v3086_v9 = vpop.permute.xlu1 %3085 }
0x10f3   :  { %v3253_v10 = vpop.permute.xlu1 %3252 }
0x11aa   :  { %v2144_v37 = vpop.f32.mrb[28].mxu0 }
0x11ab   :  { %v2148_v38 = vmul.f32 0.25, %v2144_v37  ;;  %v4152_v39 = vpop.f32.mrb[29].mxu0 }
0x11ad   :  { %v2149_v41 = vadd.f32 %v5064_v40, %v2148_v38 }
0x11af   :  { %v2151_v49 = vsel %vm2150_vm7, %v2149_v41, -inf }
0x11b0   :  { %2152 = vmax.xlane.f32.xlu0 %v2151_v49 }
0x11b3   :  { %v2477_v44 = vpop.f32.mrb[24].mxu1 }
0x11b4   :  { %v4172_v50 = vpop.f32.mrb[25].mxu1  ;;  %v2481_v57 = vmul.f32 0.25, %v2477_v44 }
0x11b6   :  { %v2482_v62 = vadd.f32 %v5064_v40, %v2481_v57 }
0x11b8   :  { %v2483_v63 = vsel %vm2150_vm7, %v2482_v62, -inf }
0x11bb   :  { %v2644_v47 = vpop.f32.mrb[26].mxu1 }
0x11bc   :  { %v4182_v48 = vpop.f32.mrb[27].mxu1  ;;  %v2648_v61 = vmul.f32 0.25, %v2644_v47 }
0x11be   :  { %v2649_v0 = vadd.f32 %v5064_v40, %v2648_v61 }
0x11c0   :  { %v2650_v1 = vsel %vm2150_vm7, %v2649_v0, -inf }
0x123d   :  { %v2153_v51 = vpop.xlane.xlu0 %2152 }
0x123e   :  { %v2154_v22 = vsub.f32 %v2149_v41, %v2153_v51 }
0x1240   :  { %v2155_v52 = vmul.f32 1.442695, %v2154_v22 }
0x1242   :  { %4419 = vpow2.f32 %v2155_v52 }
0x124c   :  { %v4420_v54 = vpop.eup %4419 }
0x124d   :  { %v2157_v55 = vsel %vm2150_vm7, %v4420_v54, 0.0 }
0x124e   :  { %2158 = vadd.xlane.f32.xlu0 %v2157_v55 }
0x1264   :  { %2237 = vrot.lane.b32.xlu0 %v2063_v42, %s4566_s0 }
0x1268   :  { %2753 = vrot.lane.b32.xlu0 %v5032_v25, %s4554_s15 }
0x126c   :  { %2915 = vrot.lane.b32.xlu0 %v5032_v25, %s4565_s2 }
0x1270   :  { %3083 = vrot.lane.b32.xlu0 %v5032_v25, %s4568_s23 }
0x1274   :  { %3250 = vrot.lane.b32.xlu0 %v5032_v25, %s4569_s7 }
0x1293   :  { %2484 = vmax.xlane.f32.xlu0 %v2483_v63 }
0x1297   :  { %2651 = vmax.xlane.f32.xlu0 %v2650_v1 }
0x12db   :  { %v2159_v2 = vpop.xlane.xlu0 %2158 }
0x12dc   :  { %4421 = vrcp.f32 %v2159_v2 }
0x12df   :  { %v2238_v11 = vpop.permute.xlu0 %2237 }
0x12e3   :  { %v2754_v6 = vpop.permute.xlu0 %2753 }
0x12e4   :  { %4189 = vmatpush3.xpose.msk.msra.mxu1 %vm224_vm2, %v2754_v6 }
0x12e5   :  { %4198 = vmatprep.subr.mxu1 %v4563_v45 }
0x12e6   :  { %v4422_v7 = vpop.eup %4421 }
0x12e7   :  { %v2161_v58 = vmul.f32 %v4422_v7, %v4420_v54  ;;  %v2916_v8 = vpop.permute.xlu0 %2915  ;;  %4191 = vmatmul.mubr.msk.f32.vlgmr.msra.gmra.mrb[28].mxu1 %vm224_vm2, %v5032_v25 }
0x12e8   :  { %4199 = vmatpush3.xpose.msk.msra.mxu1 %vm224_vm2, %v2918_v4  ;;  %4200 = vmatprep.mubr.msk.f32.mxu1 %vm4564_vm1, %v4563_v45 }
0x12e9   :  { %4156 = vmatmul.mubr.msk.f32.vlgmr.msra.gmra.mrb[30].mxu0 %vm305_vm3, %v2161_v58  ;;  %4208 = vmatprep.subr.mxu1 %v4563_v45 }
0x12ea   :  { %4159 = vmatpush3.xpose.msk.msra.mxu0 %vm224_vm2, %v2238_v11  ;;  %4160 = vmatprep.mubr.msk.f32.mxu0 %vm4564_vm1, %v4563_v45 }
0x12eb   :  { %4201 = vmatmul.mubr.msk.f32.vlgmr.msra.gmra.mrb[30].mxu1 %vm224_vm2, %v2916_v8  ;;  %4163 = vmatprep.subr.mxu0 %v4563_v45  ;;  %v3084_v59 = vpop.permute.xlu0 %3083 }
0x12ec   :  { %4209 = vmatpush3.xpose.msk.msra.mxu1 %vm224_vm2, %v3086_v9  ;;  %4210 = vmatprep.mubr.msk.f32.mxu1 %vm4564_vm1, %v4563_v45 }
0x12ed   :  { %4161 = vmatmul.mubr.msk.f32.vlgmr.msra.gmra.mrb[32].mxu0 %vm224_vm2, %v5045_v27  ;;  %4218 = vmatprep.subr.mxu1 %v4563_v45 }
0x12ee   :  { %4165 = vmatprep.mubr.msk.f32.mxu0 %vm4564_vm1, %v4563_v45 }
0x12ef   :  { %4211 = vmatmul.mubr.msk.f32.vlgmr.msra.gmra.mrb[32].mxu1 %vm224_vm2, %v3084_v59  ;;  %v3251_v12 = vpop.permute.xlu0 %3250 }
0x12f0   :  { %4219 = vmatpush3.xpose.msk.msra.mxu1 %vm224_vm2, %v3253_v10  ;;  %4220 = vmatprep.mubr.msk.f32.mxu1 %vm4564_vm1, %v4563_v45 }
0x12f1   :  { %4228 = vmatprep.subr.bf16.mxu1 %v4563_v45 }
0x12f3   :  { %4221 = vmatmul.mubr.msk.f32.vlgmr.msra.gmra.mrb[34].mxu1 %vm224_vm2, %v3251_v12 }
0x12f4   :  { %4236 = vmatprep.mubr.msk.bf16.mxu1 %vm4564_vm1, %v4563_v45 }
0x1320   :  { %v2485_v13 = vpop.xlane.xlu0 %2484 }
0x1321   :  { %v2486_v43 = vsub.f32 %v2482_v62, %v2485_v13 }
0x1323   :  { %v2487_v28 = vmul.f32 1.442695, %v2486_v43 }
0x1324   :  { %v2652_v14 = vpop.xlane.xlu0 %2651 }
0x1325   :  { %v2653_v15 = vsub.f32 %v2649_v0, %v2652_v14 }
0x1327   :  { %v2654_v17 = vmul.f32 1.442695, %v2653_v15 }
0x1329   :  { %4423 = vpow2.f32 %v2654_v17 }
0x132a   :  { %4425 = vpow2.f32 %v2487_v28 }
0x1333   :  { %v5121_v54 = vpop.eup %4423 }
0x1334   :  { %v2656_v57 = vsel %vm2150_vm7, %v5121_v54, 0.0  ;;  %v5128_v62 = vpop.eup %4425 }
0x1335   :  { %v2489_v63 = vsel %vm2150_vm7, %v5128_v62, 0.0 }
0x13ba   :  { %v2825_v46 = vpop.f32.mrb[28].mxu1 }
0x13bb   :  { %v2829_v18 = vmul.f32 0.25, %v2825_v46  ;;  %v4192_v42 = vpop.f32.mrb[29].mxu1 }
0x13bc   :  { %v5112_v20 = vpop.f32.mrb[30].mxu0 }
0x13bd   :  { %v4157_v21 = vpop.f32.mrb[31].mxu0  ;;  %v2830_v23 = vadd.f32 %v2829_v18, %v4823_v53 }
0x13be   :  { %v2989_v25 = vpop.f32.mrb[30].mxu1 }
0x13bf   :  { %v4202_v31 = vpop.f32.mrb[31].mxu1  ;;  %v2831_v27 = vsel %vm2150_vm7, %v2830_v23, -inf  ;;  %v2993_v33 = vmul.f32 0.25, %v2989_v25 }
0x13c0   :  { %v2309_v32 = vpop.f32.mrb[32].mxu0  ;;  %2832 = vmax.xlane.f32.xlu0 %v2831_v27 }
0x13c1   :  { %v2313_v34 = vmul.f32 0.25, %v2309_v32  ;;  %v4162_v37 = vpop.f32.mrb[33].mxu0  ;;  %v2994_v47 = vadd.f32 %v2993_v33, %v4823_v53 }
0x13c2   :  { %v3157_v38 = vpop.f32.mrb[32].mxu1 }
0x13c3   :  { %v3161_v39 = vmul.f32 0.25, %v3157_v38  ;;  %v4212_v41 = vpop.f32.mrb[33].mxu1  ;;  %v2314_v49 = vadd.f32 %v5064_v40, %v2313_v34  ;;  %v2995_v55 = vsel %vm2150_vm7, %v2994_v47, -inf }
0x13c5   :  { %v2315_v44 = vsel %vm2150_vm7, %v2314_v49, -inf  ;;  %v3162_v50 = vadd.f32 %v3161_v39, %v4823_v53 }
0x13c6   :  { %2316 = vmax.xlane.f32.xlu1 %v2315_v44  ;;  %v3324_v48 = vpop.f32.mrb[34].mxu1 }
0x13c7   :  { %v3328_v51 = vmul.f32 0.25, %v3324_v48  ;;  %v4222_v22 = vpop.f32.mrb[35].mxu1  ;;  %v3163_v52 = vsel %vm2150_vm7, %v3162_v50, -inf }
0x13c8   :  { %3164 = vmax.xlane.f32.xlu0 %v3163_v52 }
0x13c9   :  { %v3329_v40 = vadd.f32 %v3328_v51, %v4823_v53 }
0x13ca   :  { %2996 = vmax.xlane.f32.xlu1 %v2995_v55 }
0x13cb   :  { %v3330_v61 = vsel %vm2150_vm7, %v3329_v40, -inf }
0x13cc   :  { %2657 = vadd.xlane.f32.xlu0 %v2656_v57 }
0x13ce   :  { %3331 = vmax.xlane.f32.xlu1 %v3330_v61 }
0x13d2   :  { %2490 = vadd.xlane.f32.xlu1 %v2489_v63 }
0x144d   :  { %v2833_v0 = vpop.xlane.xlu0 %2832 }
0x144e   :  { %v2834_v1 = vsub.f32 %v2830_v23, %v2833_v0  ;;  %v4355_v0 = vld [vmem:[%s5300_s4 + $0x20] sm:$0xff]  }
0x144f   :  { %4229 = vmatpush3.bf16.msra.mxu1 %v4355_v0 }
0x1450   :  { %v2835_v2 = vmul.f32 1.442695, %v2834_v1  ;;  %4230 = vmatprep.subr.bf16.mxu1 %v4563_v45 }
0x1452   :  { %4427 = vpow2.f32 %v2835_v2 }
0x1453   :  { %v2317_v11 = vpop.xlane.xlu1 %2316 }
0x1454   :  { %v2318_v8 = vsub.f32 %v2314_v49, %v2317_v11 }
0x1455   :  { %v3165_v53 = vpop.xlane.xlu0 %3164 }
0x1456   :  { %v3166_v4 = vsub.f32 %v3162_v50, %v3165_v53  ;;  %v2319_v14 = vmul.f32 1.442695, %v2318_v8 }
0x1457   :  { %v2997_v6 = vpop.xlane.xlu1 %2996 }
0x1458   :  { %v3167_v7 = vmul.f32 1.442695, %v3166_v4  ;;  %v2998_v58 = vsub.f32 %v2994_v47, %v2997_v6  ;;  %v4356_v4 = vld [vmem:[%s5300_s4 + $0x28] sm:$0xff]  }
0x1459   :  { %v2658_v28 = vpop.xlane.xlu0 %2657  ;;  %4231 = vmatpush3.bf16.msra.mxu1 %v4356_v4 }
0x145a   :  { %4429 = vpow2.f32 %v3167_v7  ;;  %v2999_v9 = vmul.f32 1.442695, %v2998_v58  ;;  %4232 = vmatprep.subr.bf16.mxu1 %v4563_v45  ;;  %v4357_v58 = vld [vmem:[%s5300_s4 + $0x30] sm:$0xff]  }
0x145b   :  { %v3332_v59 = vpop.xlane.xlu1 %3331 }
0x145c   :  { %v5132_v10 = vpop.eup %4427  ;;  %4431 = vpow2.f32 %v2999_v9  ;;  %v3333_v12 = vsub.f32 %v3329_v40, %v3332_v59  ;;  %v4358_v59 = vld [vmem:[%s5300_s4 + $0x38] sm:$0xff]  }
0x145d   :  { %v2837_v13 = vsel %vm2150_vm7, %v5132_v10, 0.0  ;;  %4233 = vmatpush3.bf16.msra.mxu1 %v4357_v58 }
0x145e   :  { %v3334_v15 = vmul.f32 1.442695, %v3333_v12  ;;  %2838 = vadd.xlane.f32.xlu1 %v2837_v13  ;;  %4234 = vmatprep.subr.bf16.mxu1 %v4563_v45 }
0x145f   :  { %v2491_v31 = vpop.xlane.xlu1 %2490 }
0x1460   :  { %4433 = vpow2.f32 %v3334_v15 }
0x1461   :  { %4435 = vpow2.f32 %v2319_v14  ;;  %4235 = vmatpush3.bf16.msra.mxu1 %v4358_v59  ;;  %v4367_v59 = vld [vmem:[%s5302_s6 + $0x60] sm:$0xff]  }
0x1462   :  { %4252 = vmatprep.subr.bf16.mxu1 %v4563_v45 }
0x1464   :  { %v5136_v17 = vpop.eup %4429 }
0x1465   :  { %v3169_v46 = vsel %vm2150_vm7, %v5136_v17, 0.0 }
0x1466   :  { %v4432_v18 = vpop.eup %4431  ;;  %3170 = vadd.xlane.f32.xlu1 %v3169_v46 }
0x1467   :  { %v3001_v42 = vsel %vm2150_vm7, %v4432_v18, 0.0 }
0x1468   :  { %3002 = vadd.xlane.f32.xlu0 %v3001_v42 }
0x146a   :  { %v5141_v43 = vpop.eup %4433 }
0x146b   :  { %v3336_v21 = vsel %vm2150_vm7, %v5141_v43, 0.0  ;;  %v4436_v23 = vpop.eup %4435 }
0x146c   :  { %3337 = vadd.xlane.f32.xlu0 %v3336_v21  ;;  %v2321_v25 = vsel %vm2150_vm7, %v4436_v23, 0.0 }
0x1470   :  { %2322 = vadd.xlane.f32.xlu0 %v2321_v25 }
0x1477   :  { %2327 = vrot.lane.b32.xlu1 %v5042_v26, %s4565_s2 }
0x147b   :  { %2661 = vrot.lane.b32.xlu1 %v5042_v26, %s4569_s7 }
0x147f   :  { %3007 = vrot.lane.b32.xlu1 %v5025_v24, %s4565_s2 }
0x1483   :  { %3174 = vrot.lane.b32.xlu1 %v5025_v24, %s4568_s23 }
0x1486   :  { %2494 = vrot.lane.b32.xlu0 %v5042_v26, %s4568_s23 }
0x148a   :  { %3341 = vrot.lane.b32.xlu0 %v5025_v24, %s4569_s7 }
0x14eb   :  { %v2839_v27 = vpop.xlane.xlu1 %2838 }
0x14f3   :  { %v3171_v32 = vpop.xlane.xlu1 %3170 }
0x14f5   :  { %v3003_v33 = vpop.xlane.xlu0 %3002 }
0x14f7   :  { %v2328_v34 = vpop.permute.xlu1 %2327 }
0x14f8   :  { %4164 = vmatpush3.msra.mxu0 %v2328_v34 }
0x14f9   :  { %v3338_v37 = vpop.xlane.xlu0 %3337  ;;  %4173 = vmatprep.subr.mxu0 %v4563_v45 }
0x14fb   :  { %v2662_v47 = vpop.permute.xlu1 %2661 }
0x14fd   :  { %v2323_v38 = vpop.xlane.xlu0 %2322 }
0x14fe   :  { %4437 = vrcp.f32 %v2323_v38 }
0x14ff   :  { %4439 = vrcp.f32 %v2491_v31  ;;  %v3008_v52 = vpop.permute.xlu1 %3007 }
0x1500   :  { %4441 = vrcp.f32 %v2658_v28 }
0x1501   :  { %4443 = vrcp.f32 %v2839_v27  ;;  %v2495_v49 = vpop.permute.xlu0 %2494 }
0x1502   :  { %4445 = vrcp.f32 %v3003_v33 }
0x1503   :  { %4447 = vrcp.f32 %v3171_v32 }
0x1504   :  { %4449 = vrcp.f32 %v3338_v37 }
0x1508   :  { %v4438_v39 = vpop.eup %4437 }
0x1509   :  { %v2325_v26 = vmul.f32 %v4438_v39, %v4436_v23  ;;  %v4440_v41 = vpop.eup %4439 }
0x150a   :  { %v2493_v44 = vmul.f32 %v4440_v41, %v5128_v62  ;;  %v4442_v50 = vpop.eup %4441  ;;  %v3342_v62 = vpop.permute.xlu0 %3341 }
0x150b   :  { %4166 = vmatmul.mubr.msk.f32.vlgmr.msra.gmra.mrb[34].mxu0 %vm305_vm3, %v2325_v26  ;;  %v2660_v48 = vmul.f32 %v4442_v50, %v5121_v54  ;;  %v4444_v51 = vpop.eup %4443 }
0x150c   :  { %4174 = vmatpush3.msra.mxu0 %v2495_v49  ;;  %4175 = vmatprep.mubr.msk.f32.mxu0 %vm4564_vm1, %v4563_v45  ;;  %v2841_v22 = vmul.f32 %v4444_v51, %v5132_v10  ;;  %v4446_v55 = vpop.eup %4445 }
0x150d   :  { %4183 = vmatprep.subr.mxu0 %v4563_v45  ;;  %v3005_v54 = vmul.f32 %v4446_v55, %v4432_v18  ;;  %v4448_v40 = vpop.eup %4447 }
0x150e   :  { %v3173_v57 = vmul.f32 %v4448_v40, %v5136_v17  ;;  %v4450_v61 = vpop.eup %4449 }
0x150f   :  { %4176 = vmatmul.mubr.msk.f32.vlgmr.msra.gmra.mrb[36].mxu0 %vm305_vm3, %v2493_v44  ;;  %v3340_v63 = vmul.f32 %v4450_v61, %v5141_v43  ;;  %v4359_v61 = vld [vmem:[#allocation5 + $0x20] sm:$0xff]  }
0x1510   :  { %4184 = vmatpush3.msra.mxu0 %v2662_v47  ;;  %4185 = vmatprep.mubr.msk.f32.mxu0 %vm4564_vm1, %v4563_v45 }
0x1511   :  { %4193 = vmatprep.subr.mxu0 %v4563_v45 }
0x1513   :  { %4186 = vmatmul.mubr.msk.f32.vlgmr.msra.gmra.mrb[38].mxu0 %vm305_vm3, %v2660_v48 }
0x1514   :  { %4194 = vmatpush3.msra.mxu0 %v5025_v24  ;;  %4195 = vmatprep.mubr.msk.f32.mxu0 %vm4564_vm1, %v4563_v45  ;;  %v3175_v24 = vpop.permute.xlu1 %3174 }
0x1515   :  { %4203 = vmatprep.subr.mxu0 %v4563_v45 }
0x1517   :  { %4196 = vmatmul.mubr.msk.f32.vlgmr.msra.gmra.mrb[40].mxu0 %vm305_vm3, %v2841_v22 }
0x1518   :  { %4204 = vmatpush3.msra.mxu0 %v3008_v52  ;;  %4205 = vmatprep.mubr.msk.f32.mxu0 %vm4564_vm1, %v4563_v45 }
0x1519   :  { %4213 = vmatprep.subr.mxu0 %v4563_v45 }
0x151b   :  { %4206 = vmatmul.mubr.msk.f32.vlgmr.msra.gmra.mrb[42].mxu0 %vm305_vm3, %v3005_v54 }
0x151c   :  { %4214 = vmatpush3.msra.mxu0 %v3175_v24  ;;  %4215 = vmatprep.mubr.msk.f32.mxu0 %vm4564_vm1, %v4563_v45 }
0x151d   :  { %4223 = vmatprep.subr.mxu0 %v4563_v45 }
0x151f   :  { %4216 = vmatmul.mubr.msk.f32.vlgmr.msra.gmra.mrb[44].mxu0 %vm305_vm3, %v3173_v57 }
0x1520   :  { %4224 = vmatpush3.msra.mxu0 %v3342_v62  ;;  %4225 = vmatprep.mubr.msk.f32.mxu0 %vm4564_vm1, %v4563_v45  ;;  %v4361_v62 = vld [vmem:[#allocation5 + $0x30] sm:$0xff]  }
0x1521   :  { %4240 = vmatprep.subr.bf16.mxu0 %v4563_v45 }
0x1523   :  { %4226 = vmatmul.mubr.msk.f32.vlgmr.msra.gmra.mrb[46].mxu0 %vm305_vm3, %v3340_v63  ;;  %v4363_v63 = vld [vmem:[%s5302_s6 + $0x40] sm:$0xff]  }
0x1524   :  { %4248 = vmatprep.mubr.msk.bf16.mxu0 %vm4564_vm1, %v4563_v45  ;;  %4241 = vmatpush3.bf16.msra.mxu0 %v4359_v61 }
0x1525   :  { %4242 = vmatprep.subr.bf16.mxu0 %v4563_v45 }
0x15de   :  { %v2399_v1 = vpop.f32.mrb[34].mxu0 }
0x15df   :  { %v4167_v2 = vpop.f32.mrb[35].mxu0 }
0x15e2   :  { %v2566_v11 = vpop.f32.mrb[36].mxu0 }
0x15e3   :  { %v4177_v53 = vpop.f32.mrb[37].mxu0 }
0x15e6   :  { %v2733_v6 = vpop.f32.mrb[38].mxu0 }
0x15e7   :  { %v4187_v7 = vpop.f32.mrb[39].mxu0 }
0x15ea   :  { %v2911_v8 = vpop.f32.mrb[40].mxu0 }
0x15eb   :  { %v4197_v9 = vpop.f32.mrb[41].mxu0 }
0x15ec   :  { %v4364_v9 = vld [vmem:[%s5302_s6 + $0x48] sm:$0xff]  }
0x15ee   :  { %v3079_v10 = vpop.f32.mrb[42].mxu0 }
0x15ef   :  { %v4305_v12 = vpack.i.bf16 %v2399_v1, %v3079_v10  ;;  %v4207_v13 = vpop.f32.mrb[43].mxu0  ;;  %v4368_v10 = vld [vmem:[%s5302_s6 + $0x68] sm:$0xff]  }
0x15f0   :  { %v4370_v13 = vld [vmem:[%s5302_s6 + $0x78] sm:$0xff]  }
0x15f1   :  { %4306 = vrot.lane.b32.xlu1 %v4305_v12, %s4561_s20  ;;  %v4369_v12 = vld [vmem:[%s5302_s6 + $0x70] sm:$0xff]  }
0x15f2   :  { %v3246_v14 = vpop.f32.mrb[44].mxu0 }
0x15f3   :  { %v4310_v15 = vpack.i.bf16 %v2566_v11, %v3246_v14  ;;  %v4217_v17 = vpop.f32.mrb[45].mxu0  ;;  %v3540_v11 = vrot.slane %v5019_v16, %v1705_v29  ;;  %v4365_v29 = vld [vmem:[%s5302_s6 + $0x50] sm:$0xff]   ;;  %v3560_v14 = vrot.slane %v5019_v16, %v1726_v60  ;;  %v3658_v60 = vrot.slane %v5019_v16, %v1833_v19 }
0x15f4   :  { %v3764_v19 = vrot.slane %v5019_v16, %v1954_v3 }
0x15f5   :  { %4311 = vrot.lane.b32.xlu0 %v4310_v15, %s4567_s22 }
0x15f6   :  { %v3413_v46 = vpop.f32.mrb[46].mxu0 }
0x15f7   :  { %3426 = vrot.lane.b32.xlu1 %v3413_v46, %s4566_s0  ;;  %v4227_v18 = vpop.f32.mrb[47].mxu0 }
0x15f9   :  { %2746 = vrot.lane.b32.xlu0 %v2733_v6, %s4566_s0  ;;  %v3545_v6 = vrot.slane %v5019_v16, %v1711_v35  ;;  %v4366_v35 = vld [vmem:[%s5302_s6 + $0x58] sm:$0xff]   ;;  %s4570_s6 = smov [#allocation8]  }
0x15fa   :  { %s3778_s25 = sshll.u32 %s4570_s6, 4  ;;  %s3779_s25 = int_to_ptr.vmem [resolvable:$true] %s3778_s25 }
0x15fb   :  { %s4525_s26 = scalar_lea.vmem %s3779_s25, 32  ;;  %p4530_p11 = scmp.lt.s32.totalorder %s3779_s25, %s3779_s25 }
0x15fc   :  { %p4526_p10 = scmp.ne.s32.totalorder %s3779_s25, %s4525_s26  ;;  %p4531_p12 = scmp.lt.s32.totalorder %s4525_s26, %s4525_s26 }
0x15fe   :  { %p4532_p13 = por %p4531_p12, %p4530_p11 }
0x1600   :  { %p4533_p0 = pnand %p4532_p13, %p4526_p10 }
0x1663   :  { %v4307_v42 = vpop.permute.xlu1 %4306 }
0x1664   :  { %v4309_v43 = vunpack.i.h.bf16 %v4307_v42  ;;  %v4308_v21 = vunpack.i.l.bf16 %v4307_v42 }
0x1666   :  { %v3429_v28 = vsel %vm224_vm2, %v2911_v8, %v4308_v21  ;;  %v2749_v32 = vsel %vm224_vm2, %v5112_v20, %v4309_v43  ;;  %v3454_v20 = vrot.slane %v5019_v16, %v4694_v36  ;;  %v4360_v36 = vld [vmem:[#allocation5 + $0x28] sm:$0xff]  }
0x1667   :  { %v4312_v23 = vpop.permute.xlu0 %4311  ;;  %4243 = vmatpush3.bf16.msra.mxu0 %v4360_v36 }
0x1668   :  { %v4314_v25 = vunpack.i.h.bf16 %v4312_v23  ;;  %v4313_v31 = vunpack.i.l.bf16 %v4312_v23  ;;  %4244 = vmatprep.subr.bf16.mxu0 %v4563_v45 }
0x1669   :  { %v3427_v27 = vpop.permute.xlu1 %3426 }
0x166a   :  { %v3430_v33 = vsel %vm905_vm4, %v3429_v28, %v4313_v31  ;;  %v2750_v34 = vsel %vm905_vm4, %v2749_v32, %v4314_v25 }
0x166b   :  { %v3431_v37 = vsel %vm907_vm5, %v3430_v33, %v3427_v27  ;;  %v2747_v38 = vpop.permute.xlu0 %2746  ;;  %4245 = vmatpush3.bf16.msra.mxu0 %v4361_v62 }
0x166c   :  { %v3433_v39 = vrot.slane %v3431_v37, 7  ;;  %v2751_v26 = vsel %vm907_vm5, %v2750_v34, %v2747_v38  ;;  %4246 = vmatprep.subr.bf16.mxu0 %v4563_v45 }
0x166e   :  { %v3436_v41 = vsel %vm3435_vm6, %v2751_v26, %v3433_v39 }
0x166f   :  { %v3441_v49 = vpack.c.bf16 %v3436_v41, %v3436_v41 }
0x1671   :  { %4237 = vmatmul.mubr.msk.bf16.vlgmr.msra.gmra.mrb[36].mxu1 %vm75_vm0, %v3441_v49 }
0x1672   :  { %4268 = vmatprep.mubr.msk.bf16.mxu1 %vm4564_vm1, %v4563_v45  ;;  %4253 = vmatpush3.bf16.msra.mxu1 %v4363_v63 }
0x1673   :  { %4254 = vmatprep.subr.bf16.mxu1 %v4563_v45 }
0x1676   :  { %4255 = vmatpush3.bf16.msra.mxu1 %v4364_v9 }
0x1677   :  { %4256 = vmatprep.subr.bf16.mxu1 %v4563_v45 }
0x167a   :  { %4257 = vmatpush3.bf16.msra.mxu1 %v4365_v29 }
0x167b   :  { %4258 = vmatprep.subr.bf16.mxu1 %v4563_v45 }
0x167e   :  { %4259 = vmatpush3.bf16.msra.mxu1 %v4366_v35 }
0x167f   :  { %4260 = vmatprep.subr.bf16.mxu1 %v4563_v45 }
0x1682   :  { %4261 = vmatpush3.bf16.msra.mxu1 %v4367_v59 }
0x1683   :  { %4262 = vmatprep.subr.bf16.mxu1 %v4563_v45 }
0x1686   :  { %4263 = vmatpush3.bf16.msra.mxu1 %v4368_v10 }
0x1687   :  { %4264 = vmatprep.subr.bf16.mxu1 %v4563_v45 }
0x168a   :  { %4265 = vmatpush3.bf16.msra.mxu1 %v4369_v12 }
0x168b   :  { %4266 = vmatprep.subr.bf16.mxu1 %v4563_v45 }
0x168e   :  { %4267 = vmatpush3.bf16.msra.mxu1 %v4370_v13 }
0x1744   :  { %v3516_v44 = vpop.f32.mrb[36].mxu1 }
0x1745   :  { %v3517_v50 = vadd.f32 %v3516_v44, %v3454_v20  ;;  %v4238_v47 = vpop.f32.mrb[37].mxu1 }
0x1746   :  { %v3519_v48 = vpop.f32.mrb[38].mxu1 }
0x1747   :  { %v4239_v51 = vpop.f32.mrb[39].mxu1  ;;  %v3522_v22 = vadd.f32 %v3517_v50, %v5015_v56  ;;  %v4362_v56 = vld [vmem:[#allocation5 + $0x38] sm:$0xff]  }
0x1748   :  { %4247 = vmatpush3.bf16.msra.mxu0 %v4362_v56 }
0x1749   :  { %v3524_v52 = vsel %vm3523_vm8, %v3522_v22, 0.0 }
0x174a   :  { %3525 = vadd.xlane.f32.xlu1 %v3524_v52 }
0x17d7   :  { %v3526_v55 = vpop.xlane.xlu1 %3525 }
0x17d8   :  { %v3527_v54 = vmul.f32 0.015625, %v3526_v55 }
0x17da   :  { %v3528_v40 = vsub.f32 %v3522_v22, %v3527_v54 }
0x17dc   :  { %v3529_v24 = vmul.f32 %v3528_v40, %v3528_v40 }
0x17de   :  { %v3530_v57 = vsel %vm3523_vm8, %v3529_v24, 0.0 }
0x17df   :  { %3531 = vadd.xlane.f32.xlu0 %v3530_v57 }
0x186c   :  { %v3532_v0 = vpop.xlane.xlu0 %3531 }
0x186d   :  { %v3533_v1 = vmul.f32 0.015625, %v3532_v0 }
0x186f   :  { %v3534_v2 = vadd.f32 1e-12, %v3533_v1 }
0x1871   :  { %4451 = vrsqrt.f32 %v3534_v2 }
0x187b   :  { %v4452_v53 = vpop.eup %4451 }
0x187c   :  { %v3536_v4 = vmul.f32 %v4452_v53, %v3528_v40  ;;  %v3769_v40 = vrot.slane %v5019_v16, %v1960_v5 }
0x187e   :  { %v3541_v7 = vmul.f32 %v3540_v11, %v3536_v4 }
0x1880   :  { %v3546_v58 = vadd.f32 %v3545_v6, %v3541_v7 }
0x1882   :  { %v3547_v8 = vpack.c.bf16 %v3546_v58, %v3546_v58 }
0x1884   :  { %4249 = vmatmul.mubr.msk.bf16.vlgmr.msra.gmra.mrb[48].mxu0 %vm75_vm0, %v3547_v8 }
0x1957   :  { %v3622_v15 = vpop.f32.mrb[48].mxu0 }
0x1958   :  { %v3623_v17 = vadd.f32 %v3622_v15, %v3560_v14  ;;  %v4250_v46 = vpop.f32.mrb[49].mxu0 }
0x1959   :  { %v3625_v18 = vpop.f32.mrb[50].mxu0 }
0x195a   :  { %v3629_v42 = vmul.f32 0.044715, %v3623_v17  ;;  %v4251_v43 = vpop.f32.mrb[51].mxu0  ;;  %v3628_v28 = vmul.f32 0.5, %v3623_v17 }
0x195c   :  { %v3630_v21 = vmul.f32 %v3629_v42, %v3623_v17 }
0x195e   :  { %v3631_v23 = vmul.f32 %v3630_v21, %v3623_v17 }
0x1960   :  { %v3632_v25 = vadd.f32 %v3631_v23, %v3623_v17 }
0x1962   :  { %v3633_v31 = vmul.f32 0.7978846, %v3632_v25 }
0x1964   :  { %4453 = vtanh.f32 %v3633_v31 }
0x196e   :  { %v4454_v27 = vpop.eup %4453 }
0x196f   :  { %v3635_v32 = vadd.f32 1.0, %v4454_v27 }
0x1971   :  { %v3636_v45 = vmul.f32 %v3635_v32, %v3628_v28 }
0x1973   :  { %v3637_v33 = vpack.c.bf16 %v3636_v45, %v3636_v45 }
0x1975   :  { %4269 = vmatmul.mubr.bf16.vlgmr.msra.gmra.mrb[40].mxu1 %v3637_v33 }
0x1a48   :  { %v3741_v34 = vpop.f32.mrb[40].mxu1 }
0x1a49   :  { %v3742_v37 = vadd.f32 %v3741_v34, %v3658_v60  ;;  %v4270_v38 = vpop.f32.mrb[41].mxu1 }
0x1a4a   :  { %v3744_v39 = vpop.f32.mrb[42].mxu1 }
0x1a4b   :  { %v4271_v26 = vpop.f32.mrb[43].mxu1  ;;  %v3747_v41 = vadd.f32 %v3742_v37, %v3546_v58 }
0x1a4d   :  { %v3748_v49 = vsel %vm3523_vm8, %v3747_v41, 0.0 }
0x1a4e   :  { %3749 = vadd.xlane.f32.xlu0 %v3748_v49 }
0x1adb   :  { %v3750_v20 = vpop.xlane.xlu0 %3749 }
0x1adc   :  { %v3751_v44 = vmul.f32 0.015625, %v3750_v20 }
0x1ade   :  { %v3752_v50 = vsub.f32 %v3747_v41, %v3751_v44 }
0x1ae0   :  { %v3753_v47 = vmul.f32 %v3752_v50, %v3752_v50 }
0x1ae2   :  { %v3754_v48 = vsel %vm3523_vm8, %v3753_v47, 0.0 }
0x1ae3   :  { %3755 = vadd.xlane.f32.xlu0 %v3754_v48 }
0x1b70   :  { %v3756_v51 = vpop.xlane.xlu0 %3755 }
0x1b71   :  { %v3757_v22 = vmul.f32 0.015625, %v3756_v51 }
0x1b73   :  { %v3758_v52 = vadd.f32 1e-12, %v3757_v22 }
0x1b75   :  { %4455 = vrsqrt.f32 %v3758_v52 }
0x1b7f   :  { %v4456_v55 = vpop.eup %4455 }
0x1b80   :  { %v3760_v54 = vmul.f32 %v4456_v55, %v3752_v50 }
0x1b82   :  { %v3765_v24 = vmul.f32 %v3764_v19, %v3760_v54 }
0x1b84   :  { %v3770_v57 = vadd.f32 %v3769_v40, %v3765_v24 }
0x1b86   :  { %3771 = vst.msk [vmem:[#allocation8] sm:$0x3] %vm3523_vm8, %v3770_v57 }
0x1b87   :  { %4536 = shalt.err (!%p4533_p0)
}
0x1b88   :  { %s4537_s29 = scalar_lea.hbm %s5304_s8, 32 }
0x1b89   :  { %p4538_p1 = scmp.ne.s32.totalorder %s5304_s8, %s4537_s29  ;;  %p4541_p2 = scmp.lt.u32.totalorder %s4537_s29, %s5304_s8 }
0x1b8b   :  { %p4543_p3 = pnand %p4541_p2, %p4538_p1 }
0x1b8d   :  { %4546 = shalt.err (!%p4543_p3)
}
0x1b8e   :  { %3781 = dma.vmem_to_hbm [thread:$0]  %s3779_s25, 32, %s5304_s8, [#allocation4]  }
0x1b8f   :  { %4551 = dma.done.wait [#allocation4], 32  }
0x1b90   :  { %4552 = vsyncadd [#allocation4], 4294967264 }
0x1b91   :  { %3785 = vsyncpa [#allocation3], 1 }
0x1b92   :  { %3786 = vsyncpa [#allocation6], 1 }
0x1b93   :  { %3787 = vsyncpa [#allocation4], 1 }

</bundles_post_ra>
